<compile_context>
chip_gen: v7x
topology: tpu7x:2x2x1
jax: 0.10.0
libtpu: 0.0.40
codegen_flags: <defaults>
</compile_context>

<pallas_src>
import jax
import jax.numpy as jnp
from jax.experimental import pallas as pl
from jax.experimental.pallas import tpu as pltpu


# ----------------------------- Pallas kernel -------------------------------------

def fused_encoder_kernel(x_ref,        # [B, L, D_obs] VMEM f32   raw observations
                         y_ref,        # [B, L]        SMEM int32 action ids
                         z_ref,        # [B, L]        SMEM f32   rationale gate
                         wm_obs_ref,   # [D_obs, Hm]   VMEM       obs part of MLP weight
                         act_ref,      # [n_action, Hm] VMEM      embed @ wm_act + bm (folded)
                         wih_ref,      # [Hm, GW]      VMEM       GRU W_ih^T, gates r|z|n packed, lane-padded
                         bi_ref,       # [1, GW]       VMEM       b_ih + (b_hh folded for r,z), lane-padded
                         whh_ref,      # [H, GW]       VMEM       GRU W_hh^T, gates packed, lane-padded
                         bhn_ref,      # [1, H]        VMEM       b_hn (applied inside r*(...))
                         out_ref,      # [B, L, H]     VMEM f32   hidden sequence (batch-major)
                         mlp_scr):     # [L*B, Hm]     VMEM scratch, time-major MLP activations
    B, L, H = out_ref.shape
    BL = B * L
    D_obs = x_ref.shape[2]

    # ---- batched observation projection (batch-major rows j = b*L + t) ----
    # Leading-dim collapse [B, L, D] -> [B*L, D] is a layout no-op (row b*L+l == tile b,
    # sublane l).  z-gating is applied AFTER the projection (scalar commutes with Linear).
    x2 = x_ref[...].reshape(BL, D_obs)
    obs_proj = jnp.dot(x2, wm_obs_ref[...], preferred_element_type=jnp.float32)   # [BL, Hm]

    # ---- fused per-(t,b) glue: rationale gate + Embedding∘Linear fold + bias + ReLU ----
    # Rows are written TIME-major (i = t*B + b) so the per-step gi slices below are
    # contiguous sublane rows.  All of this sits in the batched (slack) phase.
    for t in range(L):
        for b in range(B):
            z_s = z_ref[b, t]                                       # SMEM scalar
            a_row = act_ref[pl.ds(y_ref[b, t], 1), :]               # [1, Hm] (bm folded in)
            o_row = obs_proj[b * L + t:b * L + t + 1, :]            # [1, Hm]
            mlp_scr[t * B + b:t * B + b + 1, :] = jnp.maximum(z_s * o_row + a_row, 0.0)

    # ---- GRU input projection for all timesteps at once (r/z recurrent biases folded) ----
    gi = jnp.dot(mlp_scr[...], wih_ref[...],
                 preferred_element_type=jnp.float32) + bi_ref[...]                 # [L*B, GW]

    whh = whh_ref[...]                                     # [H, GW] — single 128-lane group
    bhn = jnp.broadcast_to(bhn_ref[...], (B, H))           # hoisted: broadcast once
    gi_t = [gi[t * B:(t + 1) * B, :] for t in range(L)]    # h-independent, off the serial chain

    # ---- Sequential GRU recurrence, fully unrolled, h carried in registers ----
    h = jnp.zeros((B, H), jnp.float32)
    for t in range(L):                                     # L is static -> full unroll
        gh = jnp.dot(h, whh, preferred_element_type=jnp.float32)    # [B, GW], one weight tile
        r = jax.nn.sigmoid(gi_t[t][:, 0:H] + gh[:, 0:H])
        zg = jax.nn.sigmoid(gi_t[t][:, H:2 * H] + gh[:, H:2 * H])
        n = jnp.tanh(gi_t[t][:, 2 * H:3 * H] + r * (gh[:, 2 * H:3 * H] + bhn))
        h = (1.0 - zg) * n + zg * h
        out_ref[:, t, :] = h.astype(out_ref.dtype)          # direct per-step store (no stack)


# ----------------------- One-time parameter preprocessing --------------------------

def prepare_encoder_params(raw, d_obs):
    """Model-load-time folding/padding (NOT per call):
       * act_table  = embed @ wm[d_obs:] + bm            (Embedding∘Linear fold)
       * bi         = b_ih + [b_hr, b_hz, 0]             (r/z recurrent biases folded)
       * gate axis 3H packed into a single lane group padded to GW=ceil(3H/128)*128."""
    f32 = jnp.float32
    hi = jax.lax.Precision.HIGHEST
    wm = raw["wm"].astype(f32)
    Hm = wm.shape[1]
    H = raw["whhT"].shape[0]
    GW = ((3 * H + 127) // 128) * 128
    pad = GW - 3 * H

    wm_obs = wm[:d_obs]                                                     # [D_obs, Hm]
    act_table = (jnp.dot(raw["embed"].astype(f32), wm[d_obs:], precision=hi)
                 + raw["bm"].astype(f32))                                   # [n_action, Hm]

    wih_p = jnp.pad(raw["wihT"].astype(f32), ((0, 0), (0, pad)))            # [Hm, GW]
    whh_p = jnp.pad(raw["whhT"].astype(f32), ((0, 0), (0, pad)))            # [H, GW]
    bhh = raw["bhh"].astype(f32)
    bhh_rz = jnp.concatenate([bhh[:, :2 * H], jnp.zeros((1, H), f32)], axis=-1)
    bi_p = jnp.pad(raw["bih"].astype(f32) + bhh_rz, ((0, 0), (0, pad)))     # [1, GW]
    bhn = bhh[:, 2 * H:3 * H]                                               # [1, H]

    return {"wm_obs": wm_obs, "act_table": act_table, "wih_p": wih_p,
            "bi_p": bi_p, "whh_p": whh_p, "bhn": bhn, "H": H, "Hm": Hm}


# ----------------------------- Per-call wrapper -------------------------------------

def rationale_net_encoder(x, y, z, prep):
    """x: [B, L, D_obs] f32, y: [B, L] int, z: [B, L] f32 or None -> [B, L, H].
    Single pallas_call per forward; no per-call glue ops or weight re-padding."""
    B, L, _ = x.shape
    H, Hm = prep["H"], prep["Hm"]
    if z is None:
        z = jnp.ones((B, L), jnp.float32)

    return pl.pallas_call(
        fused_encoder_kernel,
        out_shape=jax.ShapeDtypeStruct((B, L, H), jnp.float32),
        in_specs=[
            pl.BlockSpec(memory_space=pltpu.MemorySpace.VMEM),   # x
            pl.BlockSpec(memory_space=pltpu.MemorySpace.SMEM),   # y (scalar table)
            pl.BlockSpec(memory_space=pltpu.MemorySpace.SMEM),   # z (scalar table)
            pl.BlockSpec(memory_space=pltpu.MemorySpace.VMEM),   # wm_obs
            pl.BlockSpec(memory_space=pltpu.MemorySpace.VMEM),   # act_table
            pl.BlockSpec(memory_space=pltpu.MemorySpace.VMEM),   # wih_p
            pl.BlockSpec(memory_space=pltpu.MemorySpace.VMEM),   # bi_p
            pl.BlockSpec(memory_space=pltpu.MemorySpace.VMEM),   # whh_p
            pl.BlockSpec(memory_space=pltpu.MemorySpace.VMEM),   # bhn
        ],
        out_specs=pl.BlockSpec(memory_space=pltpu.MemorySpace.VMEM),
        scratch_shapes=[pltpu.VMEM((L * B, Hm), jnp.float32)],
    )(x.astype(jnp.float32), y.astype(jnp.int32), z.astype(jnp.float32),
      prep["wm_obs"], prep["act_table"], prep["wih_p"], prep["bi_p"],
      prep["whh_p"], prep["bhn"])


# ----------------------------- Pure-JAX reference ----------------------------------

def reference_encoder(x, y, z, params):
    hi = jax.lax.Precision.HIGHEST
    B, L, _ = x.shape
    if z is not None:
        x = x * z[..., None]
    act = params["embed"][y]
    feat = jnp.concatenate([x, act], axis=-1).astype(jnp.float32)
    mlp = jnp.maximum(jnp.dot(feat, params["wm"], precision=hi,
                              preferred_element_type=jnp.float32) + params["bm"], 0.0)
    H = params["whhT"].shape[0]
    h = jnp.zeros((B, H), jnp.float32)
    outs = []
    for t in range(L):
        gi = jnp.dot(mlp[:, t, :], params["wihT"], precision=hi,
                     preferred_element_type=jnp.float32) + params["bih"]
        gh = jnp.dot(h, params["whhT"], precision=hi,
                     preferred_element_type=jnp.float32) + params["bhh"]
        r = jax.nn.sigmoid(gi[:, :H] + gh[:, :H])
        zg = jax.nn.sigmoid(gi[:, H:2 * H] + gh[:, H:2 * H])
        n = jnp.tanh(gi[:, 2 * H:] + r * gh[:, 2 * H:])
        h = (1.0 - zg) * n + zg * h
        outs.append(h)
    return jnp.stack(outs, axis=1)


# ----------------------------- Main ------------------------------------------------

if __name__ == "__main__":
    # Small configuration consistent with MlpRnnEncoder:
    #   D_obs=16, embed_dim=16 -> input_dim=32, hiddens=[48, 32], n_action=6, seq_len=8, B=2
    B, L = 2, 8
    D_obs, E = 16, 16
    Din = D_obs + E          # MLP input dim
    Hm = 48                  # hiddens[0]  (MLP output / GRU input)
    H = 32                   # hiddens[1]  (GRU hidden dim)
    n_action = 6

    key = jax.random.PRNGKey(0)
    ks = jax.random.split(key, 10)

    # Deterministic synthetic parameters (no checkpoint load).
    params = {
        "embed": 0.1 * jax.random.normal(ks[0], (n_action, E), jnp.float32),
        "wm":    0.2 * jax.random.normal(ks[1], (Din, Hm), jnp.float32),
        "bm":    0.05 * jax.random.normal(ks[2], (1, Hm), jnp.float32),
        "wihT":  0.2 * jax.random.normal(ks[3], (Hm, 3 * H), jnp.float32),
        "bih":   0.05 * jax.random.normal(ks[4], (1, 3 * H), jnp.float32),
        "whhT":  0.2 * jax.random.normal(ks[5], (H, 3 * H), jnp.float32),
        "bhh":   0.05 * jax.random.normal(ks[6], (1, 3 * H), jnp.float32),
    }

    x = jax.random.normal(ks[7], (B, L, D_obs), jnp.float32)
    y = jax.random.randint(ks[8], (B, L), 0, n_action, jnp.int32)
    z = jax.random.uniform(ks[9], (B, L), jnp.float32)

    # One-time (model load) preprocessing, then a single fused kernel per forward.
    prep = jax.tree_util.tree_map(jax.block_until_ready,
                                  prepare_encoder_params(params, D_obs))

    out = jax.block_until_ready(rationale_net_encoder(x, y, z, prep))
    ref = jax.block_until_ready(reference_encoder(x, y, z, params))

    assert out.shape == (B, L, H), out.shape
    assert jnp.allclose(out, ref, atol=1e-3, rtol=1e-3), float(jnp.max(jnp.abs(out - ref)))

    print("KERNEL_OK")
</pallas_src>

<mosaic_0001>
module attributes {stable_mosaic.version = 11 : i64} {
  func.func @fused_encoder_kernel(%arg0: memref<2x8x16xf32, #tpu.memory_space<vmem>>, %arg1: memref<2x8xi32, #tpu.memory_space<smem>>, %arg2: memref<2x8xf32, #tpu.memory_space<smem>>, %arg3: memref<16x48xf32, #tpu.memory_space<vmem>>, %arg4: memref<6x48xf32, #tpu.memory_space<vmem>>, %arg5: memref<48x128xf32, #tpu.memory_space<vmem>>, %arg6: memref<1x128xf32, #tpu.memory_space<vmem>>, %arg7: memref<32x128xf32, #tpu.memory_space<vmem>>, %arg8: memref<1x32xf32, #tpu.memory_space<vmem>>, %arg9: memref<2x8x32xf32, #tpu.memory_space<vmem>>, %arg10: memref<16x48xf32, #tpu.memory_space<vmem>>) attributes {dimension_semantics = [], scalar_prefetch = 0 : i64, scratch_operands = 1 : i64, tpu.core_type = #tpu.core_type<tc>} {
    %c0 = arith.constant 0 : index
    %c0_0 = arith.constant 0 : index
    %c0_1 = arith.constant 0 : index
    %0 = vector.load %arg0[%c0, %c0_0, %c0_1] : memref<2x8x16xf32, #tpu.memory_space<vmem>>, vector<2x8x16xf32>
    %1 = vector.shape_cast %0 : vector<2x8x16xf32> to vector<16x16xf32>
    %c0_2 = arith.constant 0 : index
    %c0_3 = arith.constant 0 : index
    %2 = vector.load %arg3[%c0_2, %c0_3] : memref<16x48xf32, #tpu.memory_space<vmem>>, vector<16x48xf32>
    %cst = arith.constant dense<0.000000e+00> : vector<16x48xf32>
    %3 = tpu.matmul %1, %2, %cst {dimension_numbers = #tpu.dot_dimension_numbers<[1], [0], [0], [1], [0, 0, 1, 1], [], []>} : vector<16x16xf32>, vector<16x48xf32>, vector<16x48xf32> -> vector<16x48xf32>
    %c0_4 = arith.constant 0 : index
    %c0_5 = arith.constant 0 : index
    %4 = memref.load %arg2[%c0_4, %c0_5] : memref<2x8xf32, #tpu.memory_space<smem>>
    %c0_6 = arith.constant 0 : index
    %c0_7 = arith.constant 0 : index
    %5 = memref.load %arg1[%c0_6, %c0_7] : memref<2x8xi32, #tpu.memory_space<smem>>
    %6 = arith.index_cast %5 : i32 to index
    %c0_8 = arith.constant 0 : index
    %7 = vector.load %arg4[%6, %c0_8] : memref<6x48xf32, #tpu.memory_space<vmem>>, vector<1x48xf32>
    %8 = vector.extract_strided_slice %3 {offsets = [0, 0], sizes = [1, 48], strides = [1, 1]} : vector<16x48xf32> to vector<1x48xf32>
    %9 = vector.broadcast %4 : f32 to vector<1x48xf32>
    %10 = arith.mulf %9, %8 : vector<1x48xf32>
    %11 = arith.addf %10, %7 : vector<1x48xf32>
    %cst_9 = arith.constant 0.000000e+00 : f32
    %12 = vector.broadcast %cst_9 : f32 to vector<1x48xf32>
    %13 = arith.maximumf %11, %12 : vector<1x48xf32>
    %c0_10 = arith.constant 0 : index
    %c0_11 = arith.constant 0 : index
    %14 = vector.load %arg10[%c0_10, %c0_11] : memref<16x48xf32, #tpu.memory_space<vmem>>, vector<1x48xf32>
    tpu.vector_store %arg10[%c0_10, %c0_11], %13 {strides = array<i32>} : memref<16x48xf32, #tpu.memory_space<vmem>>, vector<1x48xf32>,
    %c1 = arith.constant 1 : index
    %c0_12 = arith.constant 0 : index
    %15 = memref.load %arg2[%c1, %c0_12] : memref<2x8xf32, #tpu.memory_space<smem>>
    %c1_13 = arith.constant 1 : index
    %c0_14 = arith.constant 0 : index
    %16 = memref.load %arg1[%c1_13, %c0_14] : memref<2x8xi32, #tpu.memory_space<smem>>
    %17 = arith.index_cast %16 : i32 to index
    %c0_15 = arith.constant 0 : index
    %18 = vector.load %arg4[%17, %c0_15] : memref<6x48xf32, #tpu.memory_space<vmem>>, vector<1x48xf32>
    %19 = vector.extract_strided_slice %3 {offsets = [8, 0], sizes = [1, 48], strides = [1, 1]} : vector<16x48xf32> to vector<1x48xf32>
    %20 = vector.broadcast %15 : f32 to vector<1x48xf32>
    %21 = arith.mulf %20, %19 : vector<1x48xf32>
    %22 = arith.addf %21, %18 : vector<1x48xf32>
    %cst_16 = arith.constant 0.000000e+00 : f32
    %23 = vector.broadcast %cst_16 : f32 to vector<1x48xf32>
    %24 = arith.maximumf %22, %23 : vector<1x48xf32>
    %c1_17 = arith.constant 1 : index
    %c0_18 = arith.constant 0 : index
    %25 = vector.load %arg10[%c1_17, %c0_18] : memref<16x48xf32, #tpu.memory_space<vmem>>, vector<1x48xf32>
    tpu.vector_store %arg10[%c1_17, %c0_18], %24 {strides = array<i32>} : memref<16x48xf32, #tpu.memory_space<vmem>>, vector<1x48xf32>,
    %c0_19 = arith.constant 0 : index
    %c1_20 = arith.constant 1 : index
    %26 = memref.load %arg2[%c0_19, %c1_20] : memref<2x8xf32, #tpu.memory_space<smem>>
    %c0_21 = arith.constant 0 : index
    %c1_22 = arith.constant 1 : index
    %27 = memref.load %arg1[%c0_21, %c1_22] : memref<2x8xi32, #tpu.memory_space<smem>>
    %28 = arith.index_cast %27 : i32 to index
    %c0_23 = arith.constant 0 : index
    %29 = vector.load %arg4[%28, %c0_23] : memref<6x48xf32, #tpu.memory_space<vmem>>, vector<1x48xf32>
    %30 = vector.extract_strided_slice %3 {offsets = [1, 0], sizes = [1, 48], strides = [1, 1]} : vector<16x48xf32> to vector<1x48xf32>
    %31 = vector.broadcast %26 : f32 to vector<1x48xf32>
    %32 = arith.mulf %31, %30 : vector<1x48xf32>
    %33 = arith.addf %32, %29 : vector<1x48xf32>
    %cst_24 = arith.constant 0.000000e+00 : f32
    %34 = vector.broadcast %cst_24 : f32 to vector<1x48xf32>
    %35 = arith.maximumf %33, %34 : vector<1x48xf32>
    %c2 = arith.constant 2 : index
    %c0_25 = arith.constant 0 : index
    %36 = vector.load %arg10[%c2, %c0_25] : memref<16x48xf32, #tpu.memory_space<vmem>>, vector<1x48xf32>
    tpu.vector_store %arg10[%c2, %c0_25], %35 {strides = array<i32>} : memref<16x48xf32, #tpu.memory_space<vmem>>, vector<1x48xf32>,
    %c1_26 = arith.constant 1 : index
    %c1_27 = arith.constant 1 : index
    %37 = memref.load %arg2[%c1_26, %c1_27] : memref<2x8xf32, #tpu.memory_space<smem>>
    %c1_28 = arith.constant 1 : index
    %c1_29 = arith.constant 1 : index
    %38 = memref.load %arg1[%c1_28, %c1_29] : memref<2x8xi32, #tpu.memory_space<smem>>
    %39 = arith.index_cast %38 : i32 to index
    %c0_30 = arith.constant 0 : index
    %40 = vector.load %arg4[%39, %c0_30] : memref<6x48xf32, #tpu.memory_space<vmem>>, vector<1x48xf32>
    %41 = vector.extract_strided_slice %3 {offsets = [9, 0], sizes = [1, 48], strides = [1, 1]} : vector<16x48xf32> to vector<1x48xf32>
    %42 = vector.broadcast %37 : f32 to vector<1x48xf32>
    %43 = arith.mulf %42, %41 : vector<1x48xf32>
    %44 = arith.addf %43, %40 : vector<1x48xf32>
    %cst_31 = arith.constant 0.000000e+00 : f32
    %45 = vector.broadcast %cst_31 : f32 to vector<1x48xf32>
    %46 = arith.maximumf %44, %45 : vector<1x48xf32>
    %c3 = arith.constant 3 : index
    %c0_32 = arith.constant 0 : index
    %47 = vector.load %arg10[%c3, %c0_32] : memref<16x48xf32, #tpu.memory_space<vmem>>, vector<1x48xf32>
    tpu.vector_store %arg10[%c3, %c0_32], %46 {strides = array<i32>} : memref<16x48xf32, #tpu.memory_space<vmem>>, vector<1x48xf32>,
    %c0_33 = arith.constant 0 : index
    %c2_34 = arith.constant 2 : index
    %48 = memref.load %arg2[%c0_33, %c2_34] : memref<2x8xf32, #tpu.memory_space<smem>>
    %c0_35 = arith.constant 0 : index
    %c2_36 = arith.constant 2 : index
    %49 = memref.load %arg1[%c0_35, %c2_36] : memref<2x8xi32, #tpu.memory_space<smem>>
    %50 = arith.index_cast %49 : i32 to index
    %c0_37 = arith.constant 0 : index
    %51 = vector.load %arg4[%50, %c0_37] : memref<6x48xf32, #tpu.memory_space<vmem>>, vector<1x48xf32>
    %52 = vector.extract_strided_slice %3 {offsets = [2, 0], sizes = [1, 48], strides = [1, 1]} : vector<16x48xf32> to vector<1x48xf32>
    %53 = vector.broadcast %48 : f32 to vector<1x48xf32>
    %54 = arith.mulf %53, %52 : vector<1x48xf32>
    %55 = arith.addf %54, %51 : vector<1x48xf32>
    %cst_38 = arith.constant 0.000000e+00 : f32
    %56 = vector.broadcast %cst_38 : f32 to vector<1x48xf32>
    %57 = arith.maximumf %55, %56 : vector<1x48xf32>
    %c4 = arith.constant 4 : index
    %c0_39 = arith.constant 0 : index
    %58 = vector.load %arg10[%c4, %c0_39] : memref<16x48xf32, #tpu.memory_space<vmem>>, vector<1x48xf32>
    tpu.vector_store %arg10[%c4, %c0_39], %57 {strides = array<i32>} : memref<16x48xf32, #tpu.memory_space<vmem>>, vector<1x48xf32>,
    %c1_40 = arith.constant 1 : index
    %c2_41 = arith.constant 2 : index
    %59 = memref.load %arg2[%c1_40, %c2_41] : memref<2x8xf32, #tpu.memory_space<smem>>
    %c1_42 = arith.constant 1 : index
    %c2_43 = arith.constant 2 : index
    %60 = memref.load %arg1[%c1_42, %c2_43] : memref<2x8xi32, #tpu.memory_space<smem>>
    %61 = arith.index_cast %60 : i32 to index
    %c0_44 = arith.constant 0 : index
    %62 = vector.load %arg4[%61, %c0_44] : memref<6x48xf32, #tpu.memory_space<vmem>>, vector<1x48xf32>
    %63 = vector.extract_strided_slice %3 {offsets = [10, 0], sizes = [1, 48], strides = [1, 1]} : vector<16x48xf32> to vector<1x48xf32>
    %64 = vector.broadcast %59 : f32 to vector<1x48xf32>
    %65 = arith.mulf %64, %63 : vector<1x48xf32>
    %66 = arith.addf %65, %62 : vector<1x48xf32>
    %cst_45 = arith.constant 0.000000e+00 : f32
    %67 = vector.broadcast %cst_45 : f32 to vector<1x48xf32>
    %68 = arith.maximumf %66, %67 : vector<1x48xf32>
    %c5 = arith.constant 5 : index
    %c0_46 = arith.constant 0 : index
    %69 = vector.load %arg10[%c5, %c0_46] : memref<16x48xf32, #tpu.memory_space<vmem>>, vector<1x48xf32>
    tpu.vector_store %arg10[%c5, %c0_46], %68 {strides = array<i32>} : memref<16x48xf32, #tpu.memory_space<vmem>>, vector<1x48xf32>,
    %c0_47 = arith.constant 0 : index
    %c3_48 = arith.constant 3 : index
    %70 = memref.load %arg2[%c0_47, %c3_48] : memref<2x8xf32, #tpu.memory_space<smem>>
    %c0_49 = arith.constant 0 : index
    %c3_50 = arith.constant 3 : index
    %71 = memref.load %arg1[%c0_49, %c3_50] : memref<2x8xi32, #tpu.memory_space<smem>>
    %72 = arith.index_cast %71 : i32 to index
    %c0_51 = arith.constant 0 : index
    %73 = vector.load %arg4[%72, %c0_51] : memref<6x48xf32, #tpu.memory_space<vmem>>, vector<1x48xf32>
    %74 = vector.extract_strided_slice %3 {offsets = [3, 0], sizes = [1, 48], strides = [1, 1]} : vector<16x48xf32> to vector<1x48xf32>
    %75 = vector.broadcast %70 : f32 to vector<1x48xf32>
    %76 = arith.mulf %75, %74 : vector<1x48xf32>
    %77 = arith.addf %76, %73 : vector<1x48xf32>
    %cst_52 = arith.constant 0.000000e+00 : f32
    %78 = vector.broadcast %cst_52 : f32 to vector<1x48xf32>
    %79 = arith.maximumf %77, %78 : vector<1x48xf32>
    %c6 = arith.constant 6 : index
    %c0_53 = arith.constant 0 : index
    %80 = vector.load %arg10[%c6, %c0_53] : memref<16x48xf32, #tpu.memory_space<vmem>>, vector<1x48xf32>
    tpu.vector_store %arg10[%c6, %c0_53], %79 {strides = array<i32>} : memref<16x48xf32, #tpu.memory_space<vmem>>, vector<1x48xf32>,
    %c1_54 = arith.constant 1 : index
    %c3_55 = arith.constant 3 : index
    %81 = memref.load %arg2[%c1_54, %c3_55] : memref<2x8xf32, #tpu.memory_space<smem>>
    %c1_56 = arith.constant 1 : index
    %c3_57 = arith.constant 3 : index
    %82 = memref.load %arg1[%c1_56, %c3_57] : memref<2x8xi32, #tpu.memory_space<smem>>
    %83 = arith.index_cast %82 : i32 to index
    %c0_58 = arith.constant 0 : index
    %84 = vector.load %arg4[%83, %c0_58] : memref<6x48xf32, #tpu.memory_space<vmem>>, vector<1x48xf32>
    %85 = vector.extract_strided_slice %3 {offsets = [11, 0], sizes = [1, 48], strides = [1, 1]} : vector<16x48xf32> to vector<1x48xf32>
    %86 = vector.broadcast %81 : f32 to vector<1x48xf32>
    %87 = arith.mulf %86, %85 : vector<1x48xf32>
    %88 = arith.addf %87, %84 : vector<1x48xf32>
    %cst_59 = arith.constant 0.000000e+00 : f32
    %89 = vector.broadcast %cst_59 : f32 to vector<1x48xf32>
    %90 = arith.maximumf %88, %89 : vector<1x48xf32>
    %c7 = arith.constant 7 : index
    %c0_60 = arith.constant 0 : index
    %91 = vector.load %arg10[%c7, %c0_60] : memref<16x48xf32, #tpu.memory_space<vmem>>, vector<1x48xf32>
    tpu.vector_store %arg10[%c7, %c0_60], %90 {strides = array<i32>} : memref<16x48xf32, #tpu.memory_space<vmem>>, vector<1x48xf32>,
    %c0_61 = arith.constant 0 : index
    %c4_62 = arith.constant 4 : index
    %92 = memref.load %arg2[%c0_61, %c4_62] : memref<2x8xf32, #tpu.memory_space<smem>>
    %c0_63 = arith.constant 0 : index
    %c4_64 = arith.constant 4 : index
    %93 = memref.load %arg1[%c0_63, %c4_64] : memref<2x8xi32, #tpu.memory_space<smem>>
    %94 = arith.index_cast %93 : i32 to index
    %c0_65 = arith.constant 0 : index
    %95 = vector.load %arg4[%94, %c0_65] : memref<6x48xf32, #tpu.memory_space<vmem>>, vector<1x48xf32>
    %96 = vector.extract_strided_slice %3 {offsets = [4, 0], sizes = [1, 48], strides = [1, 1]} : vector<16x48xf32> to vector<1x48xf32>
    %97 = vector.broadcast %92 : f32 to vector<1x48xf32>
    %98 = arith.mulf %97, %96 : vector<1x48xf32>
    %99 = arith.addf %98, %95 : vector<1x48xf32>
    %cst_66 = arith.constant 0.000000e+00 : f32
    %100 = vector.broadcast %cst_66 : f32 to vector<1x48xf32>
    %101 = arith.maximumf %99, %100 : vector<1x48xf32>
    %c8 = arith.constant 8 : index
    %c0_67 = arith.constant 0 : index
    %102 = vector.load %arg10[%c8, %c0_67] : memref<16x48xf32, #tpu.memory_space<vmem>>, vector<1x48xf32>
    tpu.vector_store %arg10[%c8, %c0_67], %101 {strides = array<i32>} : memref<16x48xf32, #tpu.memory_space<vmem>>, vector<1x48xf32>,
    %c1_68 = arith.constant 1 : index
    %c4_69 = arith.constant 4 : index
    %103 = memref.load %arg2[%c1_68, %c4_69] : memref<2x8xf32, #tpu.memory_space<smem>>
    %c1_70 = arith.constant 1 : index
    %c4_71 = arith.constant 4 : index
    %104 = memref.load %arg1[%c1_70, %c4_71] : memref<2x8xi32, #tpu.memory_space<smem>>
    %105 = arith.index_cast %104 : i32 to index
    %c0_72 = arith.constant 0 : index
    %106 = vector.load %arg4[%105, %c0_72] : memref<6x48xf32, #tpu.memory_space<vmem>>, vector<1x48xf32>
    %107 = vector.extract_strided_slice %3 {offsets = [12, 0], sizes = [1, 48], strides = [1, 1]} : vector<16x48xf32> to vector<1x48xf32>
    %108 = vector.broadcast %103 : f32 to vector<1x48xf32>
    %109 = arith.mulf %108, %107 : vector<1x48xf32>
    %110 = arith.addf %109, %106 : vector<1x48xf32>
    %cst_73 = arith.constant 0.000000e+00 : f32
    %111 = vector.broadcast %cst_73 : f32 to vector<1x48xf32>
    %112 = arith.maximumf %110, %111 : vector<1x48xf32>
    %c9 = arith.constant 9 : index
    %c0_74 = arith.constant 0 : index
    %113 = vector.load %arg10[%c9, %c0_74] : memref<16x48xf32, #tpu.memory_space<vmem>>, vector<1x48xf32>
    tpu.vector_store %arg10[%c9, %c0_74], %112 {strides = array<i32>} : memref<16x48xf32, #tpu.memory_space<vmem>>, vector<1x48xf32>,
    %c0_75 = arith.constant 0 : index
    %c5_76 = arith.constant 5 : index
    %114 = memref.load %arg2[%c0_75, %c5_76] : memref<2x8xf32, #tpu.memory_space<smem>>
    %c0_77 = arith.constant 0 : index
    %c5_78 = arith.constant 5 : index
    %115 = memref.load %arg1[%c0_77, %c5_78] : memref<2x8xi32, #tpu.memory_space<smem>>
    %116 = arith.index_cast %115 : i32 to index
    %c0_79 = arith.constant 0 : index
    %117 = vector.load %arg4[%116, %c0_79] : memref<6x48xf32, #tpu.memory_space<vmem>>, vector<1x48xf32>
    %118 = vector.extract_strided_slice %3 {offsets = [5, 0], sizes = [1, 48], strides = [1, 1]} : vector<16x48xf32> to vector<1x48xf32>
    %119 = vector.broadcast %114 : f32 to vector<1x48xf32>
    %120 = arith.mulf %119, %118 : vector<1x48xf32>
    %121 = arith.addf %120, %117 : vector<1x48xf32>
    %cst_80 = arith.constant 0.000000e+00 : f32
    %122 = vector.broadcast %cst_80 : f32 to vector<1x48xf32>
    %123 = arith.maximumf %121, %122 : vector<1x48xf32>
    %c10 = arith.constant 10 : index
    %c0_81 = arith.constant 0 : index
    %124 = vector.load %arg10[%c10, %c0_81] : memref<16x48xf32, #tpu.memory_space<vmem>>, vector<1x48xf32>
    tpu.vector_store %arg10[%c10, %c0_81], %123 {strides = array<i32>} : memref<16x48xf32, #tpu.memory_space<vmem>>, vector<1x48xf32>,
    %c1_82 = arith.constant 1 : index
    %c5_83 = arith.constant 5 : index
    %125 = memref.load %arg2[%c1_82, %c5_83] : memref<2x8xf32, #tpu.memory_space<smem>>
    %c1_84 = arith.constant 1 : index
    %c5_85 = arith.constant 5 : index
    %126 = memref.load %arg1[%c1_84, %c5_85] : memref<2x8xi32, #tpu.memory_space<smem>>
    %127 = arith.index_cast %126 : i32 to index
    %c0_86 = arith.constant 0 : index
    %128 = vector.load %arg4[%127, %c0_86] : memref<6x48xf32, #tpu.memory_space<vmem>>, vector<1x48xf32>
    %129 = vector.extract_strided_slice %3 {offsets = [13, 0], sizes = [1, 48], strides = [1, 1]} : vector<16x48xf32> to vector<1x48xf32>
    %130 = vector.broadcast %125 : f32 to vector<1x48xf32>
    %131 = arith.mulf %130, %129 : vector<1x48xf32>
    %132 = arith.addf %131, %128 : vector<1x48xf32>
    %cst_87 = arith.constant 0.000000e+00 : f32
    %133 = vector.broadcast %cst_87 : f32 to vector<1x48xf32>
    %134 = arith.maximumf %132, %133 : vector<1x48xf32>
    %c11 = arith.constant 11 : index
    %c0_88 = arith.constant 0 : index
    %135 = vector.load %arg10[%c11, %c0_88] : memref<16x48xf32, #tpu.memory_space<vmem>>, vector<1x48xf32>
    tpu.vector_store %arg10[%c11, %c0_88], %134 {strides = array<i32>} : memref<16x48xf32, #tpu.memory_space<vmem>>, vector<1x48xf32>,
    %c0_89 = arith.constant 0 : index
    %c6_90 = arith.constant 6 : index
    %136 = memref.load %arg2[%c0_89, %c6_90] : memref<2x8xf32, #tpu.memory_space<smem>>
    %c0_91 = arith.constant 0 : index
    %c6_92 = arith.constant 6 : index
    %137 = memref.load %arg1[%c0_91, %c6_92] : memref<2x8xi32, #tpu.memory_space<smem>>
    %138 = arith.index_cast %137 : i32 to index
    %c0_93 = arith.constant 0 : index
    %139 = vector.load %arg4[%138, %c0_93] : memref<6x48xf32, #tpu.memory_space<vmem>>, vector<1x48xf32>
    %140 = vector.extract_strided_slice %3 {offsets = [6, 0], sizes = [1, 48], strides = [1, 1]} : vector<16x48xf32> to vector<1x48xf32>
    %141 = vector.broadcast %136 : f32 to vector<1x48xf32>
    %142 = arith.mulf %141, %140 : vector<1x48xf32>
    %143 = arith.addf %142, %139 : vector<1x48xf32>
    %cst_94 = arith.constant 0.000000e+00 : f32
    %144 = vector.broadcast %cst_94 : f32 to vector<1x48xf32>
    %145 = arith.maximumf %143, %144 : vector<1x48xf32>
    %c12 = arith.constant 12 : index
    %c0_95 = arith.constant 0 : index
    %146 = vector.load %arg10[%c12, %c0_95] : memref<16x48xf32, #tpu.memory_space<vmem>>, vector<1x48xf32>
    tpu.vector_store %arg10[%c12, %c0_95], %145 {strides = array<i32>} : memref<16x48xf32, #tpu.memory_space<vmem>>, vector<1x48xf32>,
    %c1_96 = arith.constant 1 : index
    %c6_97 = arith.constant 6 : index
    %147 = memref.load %arg2[%c1_96, %c6_97] : memref<2x8xf32, #tpu.memory_space<smem>>
    %c1_98 = arith.constant 1 : index
    %c6_99 = arith.constant 6 : index
    %148 = memref.load %arg1[%c1_98, %c6_99] : memref<2x8xi32, #tpu.memory_space<smem>>
    %149 = arith.index_cast %148 : i32 to index
    %c0_100 = arith.constant 0 : index
    %150 = vector.load %arg4[%149, %c0_100] : memref<6x48xf32, #tpu.memory_space<vmem>>, vector<1x48xf32>
    %151 = vector.extract_strided_slice %3 {offsets = [14, 0], sizes = [1, 48], strides = [1, 1]} : vector<16x48xf32> to vector<1x48xf32>
    %152 = vector.broadcast %147 : f32 to vector<1x48xf32>
    %153 = arith.mulf %152, %151 : vector<1x48xf32>
    %154 = arith.addf %153, %150 : vector<1x48xf32>
    %cst_101 = arith.constant 0.000000e+00 : f32
    %155 = vector.broadcast %cst_101 : f32 to vector<1x48xf32>
    %156 = arith.maximumf %154, %155 : vector<1x48xf32>
    %c13 = arith.constant 13 : index
    %c0_102 = arith.constant 0 : index
    %157 = vector.load %arg10[%c13, %c0_102] : memref<16x48xf32, #tpu.memory_space<vmem>>, vector<1x48xf32>
    tpu.vector_store %arg10[%c13, %c0_102], %156 {strides = array<i32>} : memref<16x48xf32, #tpu.memory_space<vmem>>, vector<1x48xf32>,
    %c0_103 = arith.constant 0 : index
    %c7_104 = arith.constant 7 : index
    %158 = memref.load %arg2[%c0_103, %c7_104] : memref<2x8xf32, #tpu.memory_space<smem>>
    %c0_105 = arith.constant 0 : index
    %c7_106 = arith.constant 7 : index
    %159 = memref.load %arg1[%c0_105, %c7_106] : memref<2x8xi32, #tpu.memory_space<smem>>
    %160 = arith.index_cast %159 : i32 to index
    %c0_107 = arith.constant 0 : index
    %161 = vector.load %arg4[%160, %c0_107] : memref<6x48xf32, #tpu.memory_space<vmem>>, vector<1x48xf32>
    %162 = vector.extract_strided_slice %3 {offsets = [7, 0], sizes = [1, 48], strides = [1, 1]} : vector<16x48xf32> to vector<1x48xf32>
    %163 = vector.broadcast %158 : f32 to vector<1x48xf32>
    %164 = arith.mulf %163, %162 : vector<1x48xf32>
    %165 = arith.addf %164, %161 : vector<1x48xf32>
    %cst_108 = arith.constant 0.000000e+00 : f32
    %166 = vector.broadcast %cst_108 : f32 to vector<1x48xf32>
    %167 = arith.maximumf %165, %166 : vector<1x48xf32>
    %c14 = arith.constant 14 : index
    %c0_109 = arith.constant 0 : index
    %168 = vector.load %arg10[%c14, %c0_109] : memref<16x48xf32, #tpu.memory_space<vmem>>, vector<1x48xf32>
    tpu.vector_store %arg10[%c14, %c0_109], %167 {strides = array<i32>} : memref<16x48xf32, #tpu.memory_space<vmem>>, vector<1x48xf32>,
    %c1_110 = arith.constant 1 : index
    %c7_111 = arith.constant 7 : index
    %169 = memref.load %arg2[%c1_110, %c7_111] : memref<2x8xf32, #tpu.memory_space<smem>>
    %c1_112 = arith.constant 1 : index
    %c7_113 = arith.constant 7 : index
    %170 = memref.load %arg1[%c1_112, %c7_113] : memref<2x8xi32, #tpu.memory_space<smem>>
    %171 = arith.index_cast %170 : i32 to index
    %c0_114 = arith.constant 0 : index
    %172 = vector.load %arg4[%171, %c0_114] : memref<6x48xf32, #tpu.memory_space<vmem>>, vector<1x48xf32>
    %173 = vector.extract_strided_slice %3 {offsets = [15, 0], sizes = [1, 48], strides = [1, 1]} : vector<16x48xf32> to vector<1x48xf32>
    %174 = vector.broadcast %169 : f32 to vector<1x48xf32>
    %175 = arith.mulf %174, %173 : vector<1x48xf32>
    %176 = arith.addf %175, %172 : vector<1x48xf32>
    %cst_115 = arith.constant 0.000000e+00 : f32
    %177 = vector.broadcast %cst_115 : f32 to vector<1x48xf32>
    %178 = arith.maximumf %176, %177 : vector<1x48xf32>
    %c15 = arith.constant 15 : index
    %c0_116 = arith.constant 0 : index
    %179 = vector.load %arg10[%c15, %c0_116] : memref<16x48xf32, #tpu.memory_space<vmem>>, vector<1x48xf32>
    tpu.vector_store %arg10[%c15, %c0_116], %178 {strides = array<i32>} : memref<16x48xf32, #tpu.memory_space<vmem>>, vector<1x48xf32>,
    %c0_117 = arith.constant 0 : index
    %c0_118 = arith.constant 0 : index
    %180 = vector.load %arg10[%c0_117, %c0_118] : memref<16x48xf32, #tpu.memory_space<vmem>>, vector<16x48xf32>
    %c0_119 = arith.constant 0 : index
    %c0_120 = arith.constant 0 : index
    %181 = vector.load %arg5[%c0_119, %c0_120] : memref<48x128xf32, #tpu.memory_space<vmem>>, vector<48x128xf32>
    %cst_121 = arith.constant dense<0.000000e+00> : vector<16x128xf32>
    %182 = tpu.matmul %180, %181, %cst_121 {dimension_numbers = #tpu.dot_dimension_numbers<[1], [0], [0], [1], [0, 0, 1, 1], [], []>} : vector<16x48xf32>, vector<48x128xf32>, vector<16x128xf32> -> vector<16x128xf32>
    %c0_122 = arith.constant 0 : index
    %c0_123 = arith.constant 0 : index
    %183 = vector.load %arg6[%c0_122, %c0_123] : memref<1x128xf32, #tpu.memory_space<vmem>>, vector<1x128xf32>
    %184 = vector.broadcast %183 : vector<1x128xf32> to vector<16x128xf32>
    %185 = arith.addf %182, %184 : vector<16x128xf32>
    %c0_124 = arith.constant 0 : index
    %c0_125 = arith.constant 0 : index
    %186 = vector.load %arg7[%c0_124, %c0_125] : memref<32x128xf32, #tpu.memory_space<vmem>>, vector<32x128xf32>
    %c0_126 = arith.constant 0 : index
    %c0_127 = arith.constant 0 : index
    %187 = vector.load %arg8[%c0_126, %c0_127] : memref<1x32xf32, #tpu.memory_space<vmem>>, vector<1x32xf32>
    %188 = vector.shape_cast %187 : vector<1x32xf32> to vector<1x32xf32>
    %189 = vector.broadcast %188 : vector<1x32xf32> to vector<2x32xf32>
    %190 = vector.extract_strided_slice %185 {offsets = [0, 0], sizes = [2, 128], strides = [1, 1]} : vector<16x128xf32> to vector<2x128xf32>
    %191 = vector.extract_strided_slice %185 {offsets = [2, 0], sizes = [2, 128], strides = [1, 1]} : vector<16x128xf32> to vector<2x128xf32>
    %192 = vector.extract_strided_slice %185 {offsets = [4, 0], sizes = [2, 128], strides = [1, 1]} : vector<16x128xf32> to vector<2x128xf32>
    %193 = vector.extract_strided_slice %185 {offsets = [6, 0], sizes = [2, 128], strides = [1, 1]} : vector<16x128xf32> to vector<2x128xf32>
    %194 = vector.extract_strided_slice %185 {offsets = [8, 0], sizes = [2, 128], strides = [1, 1]} : vector<16x128xf32> to vector<2x128xf32>
    %195 = vector.extract_strided_slice %185 {offsets = [10, 0], sizes = [2, 128], strides = [1, 1]} : vector<16x128xf32> to vector<2x128xf32>
    %196 = vector.extract_strided_slice %185 {offsets = [12, 0], sizes = [2, 128], strides = [1, 1]} : vector<16x128xf32> to vector<2x128xf32>
    %197 = vector.extract_strided_slice %185 {offsets = [14, 0], sizes = [2, 128], strides = [1, 1]} : vector<16x128xf32> to vector<2x128xf32>
    %cst_128 = arith.constant 0.000000e+00 : f32
    %198 = vector.broadcast %cst_128 : f32 to vector<2x32xf32>
    %cst_129 = arith.constant dense<0.000000e+00> : vector<2x128xf32>
    %199 = tpu.matmul %198, %186, %cst_129 {dimension_numbers = #tpu.dot_dimension_numbers<[1], [0], [0], [1], [0, 0, 1, 1], [], []>} : vector<2x32xf32>, vector<32x128xf32>, vector<2x128xf32> -> vector<2x128xf32>
    %200 = vector.extract_strided_slice %190 {offsets = [0, 0], sizes = [2, 32], strides = [1, 1]} : vector<2x128xf32> to vector<2x32xf32>
    %201 = vector.extract_strided_slice %199 {offsets = [0, 0], sizes = [2, 32], strides = [1, 1]} : vector<2x128xf32> to vector<2x32xf32>
    %202 = arith.addf %200, %201 : vector<2x32xf32>
    %203 = arith.negf %202 : vector<2x32xf32>
    %204 = math.exp %203 : vector<2x32xf32>
    %cst_130 = arith.constant 1.000000e+00 : f32
    %205 = vector.broadcast %cst_130 : f32 to vector<2x32xf32>
    %206 = arith.addf %205, %204 : vector<2x32xf32>
    %207 = arith.divf %205, %206 : vector<2x32xf32>
    %208 = vector.extract_strided_slice %190 {offsets = [0, 32], sizes = [2, 32], strides = [1, 1]} : vector<2x128xf32> to vector<2x32xf32>
    %209 = vector.extract_strided_slice %199 {offsets = [0, 32], sizes = [2, 32], strides = [1, 1]} : vector<2x128xf32> to vector<2x32xf32>
    %210 = arith.addf %208, %209 : vector<2x32xf32>
    %211 = arith.negf %210 : vector<2x32xf32>
    %212 = math.exp %211 : vector<2x32xf32>
    %cst_131 = arith.constant 1.000000e+00 : f32
    %213 = vector.broadcast %cst_131 : f32 to vector<2x32xf32>
    %214 = arith.addf %213, %212 : vector<2x32xf32>
    %215 = arith.divf %213, %214 : vector<2x32xf32>
    %216 = vector.extract_strided_slice %190 {offsets = [0, 64], sizes = [2, 32], strides = [1, 1]} : vector<2x128xf32> to vector<2x32xf32>
    %217 = vector.extract_strided_slice %199 {offsets = [0, 64], sizes = [2, 32], strides = [1, 1]} : vector<2x128xf32> to vector<2x32xf32>
    %218 = arith.addf %217, %189 : vector<2x32xf32>
    %219 = arith.mulf %207, %218 : vector<2x32xf32>
    %220 = arith.addf %216, %219 : vector<2x32xf32>
    %221 = math.tanh %220 : vector<2x32xf32>
    %cst_132 = arith.constant 1.000000e+00 : f32
    %222 = vector.broadcast %cst_132 : f32 to vector<2x32xf32>
    %223 = arith.subf %222, %215 : vector<2x32xf32>
    %224 = arith.mulf %223, %221 : vector<2x32xf32>
    %225 = arith.mulf %215, %198 : vector<2x32xf32>
    %226 = arith.addf %224, %225 : vector<2x32xf32>
    %c0_133 = arith.constant 0 : index
    %c0_134 = arith.constant 0 : index
    %c0_135 = arith.constant 0 : index
    %227 = vector.load %arg9[%c0_133, %c0_134, %c0_135] : memref<2x8x32xf32, #tpu.memory_space<vmem>>, vector<2x1x32xf32>
    %228 = vector.shape_cast %227 : vector<2x1x32xf32> to vector<2x32xf32>
    %229 = vector.shape_cast %226 : vector<2x32xf32> to vector<2x1x32xf32>
    tpu.vector_store %arg9[%c0_133, %c0_134, %c0_135], %229 {strides = array<i32>} : memref<2x8x32xf32, #tpu.memory_space<vmem>>, vector<2x1x32xf32>,
    %cst_136 = arith.constant dense<0.000000e+00> : vector<2x128xf32>
    %230 = tpu.matmul %226, %186, %cst_136 {dimension_numbers = #tpu.dot_dimension_numbers<[1], [0], [0], [1], [0, 0, 1, 1], [], []>} : vector<2x32xf32>, vector<32x128xf32>, vector<2x128xf32> -> vector<2x128xf32>
    %231 = vector.extract_strided_slice %191 {offsets = [0, 0], sizes = [2, 32], strides = [1, 1]} : vector<2x128xf32> to vector<2x32xf32>
    %232 = vector.extract_strided_slice %230 {offsets = [0, 0], sizes = [2, 32], strides = [1, 1]} : vector<2x128xf32> to vector<2x32xf32>
    %233 = arith.addf %231, %232 : vector<2x32xf32>
    %234 = arith.negf %233 : vector<2x32xf32>
    %235 = math.exp %234 : vector<2x32xf32>
    %cst_137 = arith.constant 1.000000e+00 : f32
    %236 = vector.broadcast %cst_137 : f32 to vector<2x32xf32>
    %237 = arith.addf %236, %235 : vector<2x32xf32>
    %238 = arith.divf %236, %237 : vector<2x32xf32>
    %239 = vector.extract_strided_slice %191 {offsets = [0, 32], sizes = [2, 32], strides = [1, 1]} : vector<2x128xf32> to vector<2x32xf32>
    %240 = vector.extract_strided_slice %230 {offsets = [0, 32], sizes = [2, 32], strides = [1, 1]} : vector<2x128xf32> to vector<2x32xf32>
    %241 = arith.addf %239, %240 : vector<2x32xf32>
    %242 = arith.negf %241 : vector<2x32xf32>
    %243 = math.exp %242 : vector<2x32xf32>
    %cst_138 = arith.constant 1.000000e+00 : f32
    %244 = vector.broadcast %cst_138 : f32 to vector<2x32xf32>
    %245 = arith.addf %244, %243 : vector<2x32xf32>
    %246 = arith.divf %244, %245 : vector<2x32xf32>
    %247 = vector.extract_strided_slice %191 {offsets = [0, 64], sizes = [2, 32], strides = [1, 1]} : vector<2x128xf32> to vector<2x32xf32>
    %248 = vector.extract_strided_slice %230 {offsets = [0, 64], sizes = [2, 32], strides = [1, 1]} : vector<2x128xf32> to vector<2x32xf32>
    %249 = arith.addf %248, %189 : vector<2x32xf32>
    %250 = arith.mulf %238, %249 : vector<2x32xf32>
    %251 = arith.addf %247, %250 : vector<2x32xf32>
    %252 = math.tanh %251 : vector<2x32xf32>
    %cst_139 = arith.constant 1.000000e+00 : f32
    %253 = vector.broadcast %cst_139 : f32 to vector<2x32xf32>
    %254 = arith.subf %253, %246 : vector<2x32xf32>
    %255 = arith.mulf %254, %252 : vector<2x32xf32>
    %256 = arith.mulf %246, %226 : vector<2x32xf32>
    %257 = arith.addf %255, %256 : vector<2x32xf32>
    %c0_140 = arith.constant 0 : index
    %c1_141 = arith.constant 1 : index
    %c0_142 = arith.constant 0 : index
    %258 = vector.load %arg9[%c0_140, %c1_141, %c0_142] : memref<2x8x32xf32, #tpu.memory_space<vmem>>, vector<2x1x32xf32>
    %259 = vector.shape_cast %258 : vector<2x1x32xf32> to vector<2x32xf32>
    %260 = vector.shape_cast %257 : vector<2x32xf32> to vector<2x1x32xf32>
    tpu.vector_store %arg9[%c0_140, %c1_141, %c0_142], %260 {strides = array<i32>} : memref<2x8x32xf32, #tpu.memory_space<vmem>>, vector<2x1x32xf32>,
    %cst_143 = arith.constant dense<0.000000e+00> : vector<2x128xf32>
    %261 = tpu.matmul %257, %186, %cst_143 {dimension_numbers = #tpu.dot_dimension_numbers<[1], [0], [0], [1], [0, 0, 1, 1], [], []>} : vector<2x32xf32>, vector<32x128xf32>, vector<2x128xf32> -> vector<2x128xf32>
    %262 = vector.extract_strided_slice %192 {offsets = [0, 0], sizes = [2, 32], strides = [1, 1]} : vector<2x128xf32> to vector<2x32xf32>
    %263 = vector.extract_strided_slice %261 {offsets = [0, 0], sizes = [2, 32], strides = [1, 1]} : vector<2x128xf32> to vector<2x32xf32>
    %264 = arith.addf %262, %263 : vector<2x32xf32>
    %265 = arith.negf %264 : vector<2x32xf32>
    %266 = math.exp %265 : vector<2x32xf32>
    %cst_144 = arith.constant 1.000000e+00 : f32
    %267 = vector.broadcast %cst_144 : f32 to vector<2x32xf32>
    %268 = arith.addf %267, %266 : vector<2x32xf32>
    %269 = arith.divf %267, %268 : vector<2x32xf32>
    %270 = vector.extract_strided_slice %192 {offsets = [0, 32], sizes = [2, 32], strides = [1, 1]} : vector<2x128xf32> to vector<2x32xf32>
    %271 = vector.extract_strided_slice %261 {offsets = [0, 32], sizes = [2, 32], strides = [1, 1]} : vector<2x128xf32> to vector<2x32xf32>
    %272 = arith.addf %270, %271 : vector<2x32xf32>
    %273 = arith.negf %272 : vector<2x32xf32>
    %274 = math.exp %273 : vector<2x32xf32>
    %cst_145 = arith.constant 1.000000e+00 : f32
    %275 = vector.broadcast %cst_145 : f32 to vector<2x32xf32>
    %276 = arith.addf %275, %274 : vector<2x32xf32>
    %277 = arith.divf %275, %276 : vector<2x32xf32>
    %278 = vector.extract_strided_slice %192 {offsets = [0, 64], sizes = [2, 32], strides = [1, 1]} : vector<2x128xf32> to vector<2x32xf32>
    %279 = vector.extract_strided_slice %261 {offsets = [0, 64], sizes = [2, 32], strides = [1, 1]} : vector<2x128xf32> to vector<2x32xf32>
    %280 = arith.addf %279, %189 : vector<2x32xf32>
    %281 = arith.mulf %269, %280 : vector<2x32xf32>
    %282 = arith.addf %278, %281 : vector<2x32xf32>
    %283 = math.tanh %282 : vector<2x32xf32>
    %cst_146 = arith.constant 1.000000e+00 : f32
    %284 = vector.broadcast %cst_146 : f32 to vector<2x32xf32>
    %285 = arith.subf %284, %277 : vector<2x32xf32>
    %286 = arith.mulf %285, %283 : vector<2x32xf32>
    %287 = arith.mulf %277, %257 : vector<2x32xf32>
    %288 = arith.addf %286, %287 : vector<2x32xf32>
    %c0_147 = arith.constant 0 : index
    %c2_148 = arith.constant 2 : index
    %c0_149 = arith.constant 0 : index
    %289 = vector.load %arg9[%c0_147, %c2_148, %c0_149] : memref<2x8x32xf32, #tpu.memory_space<vmem>>, vector<2x1x32xf32>
    %290 = vector.shape_cast %289 : vector<2x1x32xf32> to vector<2x32xf32>
    %291 = vector.shape_cast %288 : vector<2x32xf32> to vector<2x1x32xf32>
    tpu.vector_store %arg9[%c0_147, %c2_148, %c0_149], %291 {strides = array<i32>} : memref<2x8x32xf32, #tpu.memory_space<vmem>>, vector<2x1x32xf32>,
    %cst_150 = arith.constant dense<0.000000e+00> : vector<2x128xf32>
    %292 = tpu.matmul %288, %186, %cst_150 {dimension_numbers = #tpu.dot_dimension_numbers<[1], [0], [0], [1], [0, 0, 1, 1], [], []>} : vector<2x32xf32>, vector<32x128xf32>, vector<2x128xf32> -> vector<2x128xf32>
    %293 = vector.extract_strided_slice %193 {offsets = [0, 0], sizes = [2, 32], strides = [1, 1]} : vector<2x128xf32> to vector<2x32xf32>
    %294 = vector.extract_strided_slice %292 {offsets = [0, 0], sizes = [2, 32], strides = [1, 1]} : vector<2x128xf32> to vector<2x32xf32>
    %295 = arith.addf %293, %294 : vector<2x32xf32>
    %296 = arith.negf %295 : vector<2x32xf32>
    %297 = math.exp %296 : vector<2x32xf32>
    %cst_151 = arith.constant 1.000000e+00 : f32
    %298 = vector.broadcast %cst_151 : f32 to vector<2x32xf32>
    %299 = arith.addf %298, %297 : vector<2x32xf32>
    %300 = arith.divf %298, %299 : vector<2x32xf32>
    %301 = vector.extract_strided_slice %193 {offsets = [0, 32], sizes = [2, 32], strides = [1, 1]} : vector<2x128xf32> to vector<2x32xf32>
    %302 = vector.extract_strided_slice %292 {offsets = [0, 32], sizes = [2, 32], strides = [1, 1]} : vector<2x128xf32> to vector<2x32xf32>
    %303 = arith.addf %301, %302 : vector<2x32xf32>
    %304 = arith.negf %303 : vector<2x32xf32>
    %305 = math.exp %304 : vector<2x32xf32>
    %cst_152 = arith.constant 1.000000e+00 : f32
    %306 = vector.broadcast %cst_152 : f32 to vector<2x32xf32>
    %307 = arith.addf %306, %305 : vector<2x32xf32>
    %308 = arith.divf %306, %307 : vector<2x32xf32>
    %309 = vector.extract_strided_slice %193 {offsets = [0, 64], sizes = [2, 32], strides = [1, 1]} : vector<2x128xf32> to vector<2x32xf32>
    %310 = vector.extract_strided_slice %292 {offsets = [0, 64], sizes = [2, 32], strides = [1, 1]} : vector<2x128xf32> to vector<2x32xf32>
    %311 = arith.addf %310, %189 : vector<2x32xf32>
    %312 = arith.mulf %300, %311 : vector<2x32xf32>
    %313 = arith.addf %309, %312 : vector<2x32xf32>
    %314 = math.tanh %313 : vector<2x32xf32>
    %cst_153 = arith.constant 1.000000e+00 : f32
    %315 = vector.broadcast %cst_153 : f32 to vector<2x32xf32>
    %316 = arith.subf %315, %308 : vector<2x32xf32>
    %317 = arith.mulf %316, %314 : vector<2x32xf32>
    %318 = arith.mulf %308, %288 : vector<2x32xf32>
    %319 = arith.addf %317, %318 : vector<2x32xf32>
    %c0_154 = arith.constant 0 : index
    %c3_155 = arith.constant 3 : index
    %c0_156 = arith.constant 0 : index
    %320 = vector.load %arg9[%c0_154, %c3_155, %c0_156] : memref<2x8x32xf32, #tpu.memory_space<vmem>>, vector<2x1x32xf32>
    %321 = vector.shape_cast %320 : vector<2x1x32xf32> to vector<2x32xf32>
    %322 = vector.shape_cast %319 : vector<2x32xf32> to vector<2x1x32xf32>
    tpu.vector_store %arg9[%c0_154, %c3_155, %c0_156], %322 {strides = array<i32>} : memref<2x8x32xf32, #tpu.memory_space<vmem>>, vector<2x1x32xf32>,
    %cst_157 = arith.constant dense<0.000000e+00> : vector<2x128xf32>
    %323 = tpu.matmul %319, %186, %cst_157 {dimension_numbers = #tpu.dot_dimension_numbers<[1], [0], [0], [1], [0, 0, 1, 1], [], []>} : vector<2x32xf32>, vector<32x128xf32>, vector<2x128xf32> -> vector<2x128xf32>
    %324 = vector.extract_strided_slice %194 {offsets = [0, 0], sizes = [2, 32], strides = [1, 1]} : vector<2x128xf32> to vector<2x32xf32>
    %325 = vector.extract_strided_slice %323 {offsets = [0, 0], sizes = [2, 32], strides = [1, 1]} : vector<2x128xf32> to vector<2x32xf32>
    %326 = arith.addf %324, %325 : vector<2x32xf32>
    %327 = arith.negf %326 : vector<2x32xf32>
    %328 = math.exp %327 : vector<2x32xf32>
    %cst_158 = arith.constant 1.000000e+00 : f32
    %329 = vector.broadcast %cst_158 : f32 to vector<2x32xf32>
    %330 = arith.addf %329, %328 : vector<2x32xf32>
    %331 = arith.divf %329, %330 : vector<2x32xf32>
    %332 = vector.extract_strided_slice %194 {offsets = [0, 32], sizes = [2, 32], strides = [1, 1]} : vector<2x128xf32> to vector<2x32xf32>
    %333 = vector.extract_strided_slice %323 {offsets = [0, 32], sizes = [2, 32], strides = [1, 1]} : vector<2x128xf32> to vector<2x32xf32>
    %334 = arith.addf %332, %333 : vector<2x32xf32>
    %335 = arith.negf %334 : vector<2x32xf32>
    %336 = math.exp %335 : vector<2x32xf32>
    %cst_159 = arith.constant 1.000000e+00 : f32
    %337 = vector.broadcast %cst_159 : f32 to vector<2x32xf32>
    %338 = arith.addf %337, %336 : vector<2x32xf32>
    %339 = arith.divf %337, %338 : vector<2x32xf32>
    %340 = vector.extract_strided_slice %194 {offsets = [0, 64], sizes = [2, 32], strides = [1, 1]} : vector<2x128xf32> to vector<2x32xf32>
    %341 = vector.extract_strided_slice %323 {offsets = [0, 64], sizes = [2, 32], strides = [1, 1]} : vector<2x128xf32> to vector<2x32xf32>
    %342 = arith.addf %341, %189 : vector<2x32xf32>
    %343 = arith.mulf %331, %342 : vector<2x32xf32>
    %344 = arith.addf %340, %343 : vector<2x32xf32>
    %345 = math.tanh %344 : vector<2x32xf32>
    %cst_160 = arith.constant 1.000000e+00 : f32
    %346 = vector.broadcast %cst_160 : f32 to vector<2x32xf32>
    %347 = arith.subf %346, %339 : vector<2x32xf32>
    %348 = arith.mulf %347, %345 : vector<2x32xf32>
    %349 = arith.mulf %339, %319 : vector<2x32xf32>
    %350 = arith.addf %348, %349 : vector<2x32xf32>
    %c0_161 = arith.constant 0 : index
    %c4_162 = arith.constant 4 : index
    %c0_163 = arith.constant 0 : index
    %351 = vector.load %arg9[%c0_161, %c4_162, %c0_163] : memref<2x8x32xf32, #tpu.memory_space<vmem>>, vector<2x1x32xf32>
    %352 = vector.shape_cast %351 : vector<2x1x32xf32> to vector<2x32xf32>
    %353 = vector.shape_cast %350 : vector<2x32xf32> to vector<2x1x32xf32>
    tpu.vector_store %arg9[%c0_161, %c4_162, %c0_163], %353 {strides = array<i32>} : memref<2x8x32xf32, #tpu.memory_space<vmem>>, vector<2x1x32xf32>,
    %cst_164 = arith.constant dense<0.000000e+00> : vector<2x128xf32>
    %354 = tpu.matmul %350, %186, %cst_164 {dimension_numbers = #tpu.dot_dimension_numbers<[1], [0], [0], [1], [0, 0, 1, 1], [], []>} : vector<2x32xf32>, vector<32x128xf32>, vector<2x128xf32> -> vector<2x128xf32>
    %355 = vector.extract_strided_slice %195 {offsets = [0, 0], sizes = [2, 32], strides = [1, 1]} : vector<2x128xf32> to vector<2x32xf32>
    %356 = vector.extract_strided_slice %354 {offsets = [0, 0], sizes = [2, 32], strides = [1, 1]} : vector<2x128xf32> to vector<2x32xf32>
    %357 = arith.addf %355, %356 : vector<2x32xf32>
    %358 = arith.negf %357 : vector<2x32xf32>
    %359 = math.exp %358 : vector<2x32xf32>
    %cst_165 = arith.constant 1.000000e+00 : f32
    %360 = vector.broadcast %cst_165 : f32 to vector<2x32xf32>
    %361 = arith.addf %360, %359 : vector<2x32xf32>
    %362 = arith.divf %360, %361 : vector<2x32xf32>
    %363 = vector.extract_strided_slice %195 {offsets = [0, 32], sizes = [2, 32], strides = [1, 1]} : vector<2x128xf32> to vector<2x32xf32>
    %364 = vector.extract_strided_slice %354 {offsets = [0, 32], sizes = [2, 32], strides = [1, 1]} : vector<2x128xf32> to vector<2x32xf32>
    %365 = arith.addf %363, %364 : vector<2x32xf32>
    %366 = arith.negf %365 : vector<2x32xf32>
    %367 = math.exp %366 : vector<2x32xf32>
    %cst_166 = arith.constant 1.000000e+00 : f32
    %368 = vector.broadcast %cst_166 : f32 to vector<2x32xf32>
    %369 = arith.addf %368, %367 : vector<2x32xf32>
    %370 = arith.divf %368, %369 : vector<2x32xf32>
    %371 = vector.extract_strided_slice %195 {offsets = [0, 64], sizes = [2, 32], strides = [1, 1]} : vector<2x128xf32> to vector<2x32xf32>
    %372 = vector.extract_strided_slice %354 {offsets = [0, 64], sizes = [2, 32], strides = [1, 1]} : vector<2x128xf32> to vector<2x32xf32>
    %373 = arith.addf %372, %189 : vector<2x32xf32>
    %374 = arith.mulf %362, %373 : vector<2x32xf32>
    %375 = arith.addf %371, %374 : vector<2x32xf32>
    %376 = math.tanh %375 : vector<2x32xf32>
    %cst_167 = arith.constant 1.000000e+00 : f32
    %377 = vector.broadcast %cst_167 : f32 to vector<2x32xf32>
    %378 = arith.subf %377, %370 : vector<2x32xf32>
    %379 = arith.mulf %378, %376 : vector<2x32xf32>
    %380 = arith.mulf %370, %350 : vector<2x32xf32>
    %381 = arith.addf %379, %380 : vector<2x32xf32>
    %c0_168 = arith.constant 0 : index
    %c5_169 = arith.constant 5 : index
    %c0_170 = arith.constant 0 : index
    %382 = vector.load %arg9[%c0_168, %c5_169, %c0_170] : memref<2x8x32xf32, #tpu.memory_space<vmem>>, vector<2x1x32xf32>
    %383 = vector.shape_cast %382 : vector<2x1x32xf32> to vector<2x32xf32>
    %384 = vector.shape_cast %381 : vector<2x32xf32> to vector<2x1x32xf32>
    tpu.vector_store %arg9[%c0_168, %c5_169, %c0_170], %384 {strides = array<i32>} : memref<2x8x32xf32, #tpu.memory_space<vmem>>, vector<2x1x32xf32>,
    %cst_171 = arith.constant dense<0.000000e+00> : vector<2x128xf32>
    %385 = tpu.matmul %381, %186, %cst_171 {dimension_numbers = #tpu.dot_dimension_numbers<[1], [0], [0], [1], [0, 0, 1, 1], [], []>} : vector<2x32xf32>, vector<32x128xf32>, vector<2x128xf32> -> vector<2x128xf32>
    %386 = vector.extract_strided_slice %196 {offsets = [0, 0], sizes = [2, 32], strides = [1, 1]} : vector<2x128xf32> to vector<2x32xf32>
    %387 = vector.extract_strided_slice %385 {offsets = [0, 0], sizes = [2, 32], strides = [1, 1]} : vector<2x128xf32> to vector<2x32xf32>
    %388 = arith.addf %386, %387 : vector<2x32xf32>
    %389 = arith.negf %388 : vector<2x32xf32>
    %390 = math.exp %389 : vector<2x32xf32>
    %cst_172 = arith.constant 1.000000e+00 : f32
    %391 = vector.broadcast %cst_172 : f32 to vector<2x32xf32>
    %392 = arith.addf %391, %390 : vector<2x32xf32>
    %393 = arith.divf %391, %392 : vector<2x32xf32>
    %394 = vector.extract_strided_slice %196 {offsets = [0, 32], sizes = [2, 32], strides = [1, 1]} : vector<2x128xf32> to vector<2x32xf32>
    %395 = vector.extract_strided_slice %385 {offsets = [0, 32], sizes = [2, 32], strides = [1, 1]} : vector<2x128xf32> to vector<2x32xf32>
    %396 = arith.addf %394, %395 : vector<2x32xf32>
    %397 = arith.negf %396 : vector<2x32xf32>
    %398 = math.exp %397 : vector<2x32xf32>
    %cst_173 = arith.constant 1.000000e+00 : f32
    %399 = vector.broadcast %cst_173 : f32 to vector<2x32xf32>
    %400 = arith.addf %399, %398 : vector<2x32xf32>
    %401 = arith.divf %399, %400 : vector<2x32xf32>
    %402 = vector.extract_strided_slice %196 {offsets = [0, 64], sizes = [2, 32], strides = [1, 1]} : vector<2x128xf32> to vector<2x32xf32>
    %403 = vector.extract_strided_slice %385 {offsets = [0, 64], sizes = [2, 32], strides = [1, 1]} : vector<2x128xf32> to vector<2x32xf32>
    %404 = arith.addf %403, %189 : vector<2x32xf32>
    %405 = arith.mulf %393, %404 : vector<2x32xf32>
    %406 = arith.addf %402, %405 : vector<2x32xf32>
    %407 = math.tanh %406 : vector<2x32xf32>
    %cst_174 = arith.constant 1.000000e+00 : f32
    %408 = vector.broadcast %cst_174 : f32 to vector<2x32xf32>
    %409 = arith.subf %408, %401 : vector<2x32xf32>
    %410 = arith.mulf %409, %407 : vector<2x32xf32>
    %411 = arith.mulf %401, %381 : vector<2x32xf32>
    %412 = arith.addf %410, %411 : vector<2x32xf32>
    %c0_175 = arith.constant 0 : index
    %c6_176 = arith.constant 6 : index
    %c0_177 = arith.constant 0 : index
    %413 = vector.load %arg9[%c0_175, %c6_176, %c0_177] : memref<2x8x32xf32, #tpu.memory_space<vmem>>, vector<2x1x32xf32>
    %414 = vector.shape_cast %413 : vector<2x1x32xf32> to vector<2x32xf32>
    %415 = vector.shape_cast %412 : vector<2x32xf32> to vector<2x1x32xf32>
    tpu.vector_store %arg9[%c0_175, %c6_176, %c0_177], %415 {strides = array<i32>} : memref<2x8x32xf32, #tpu.memory_space<vmem>>, vector<2x1x32xf32>,
    %cst_178 = arith.constant dense<0.000000e+00> : vector<2x128xf32>
    %416 = tpu.matmul %412, %186, %cst_178 {dimension_numbers = #tpu.dot_dimension_numbers<[1], [0], [0], [1], [0, 0, 1, 1], [], []>} : vector<2x32xf32>, vector<32x128xf32>, vector<2x128xf32> -> vector<2x128xf32>
    %417 = vector.extract_strided_slice %197 {offsets = [0, 0], sizes = [2, 32], strides = [1, 1]} : vector<2x128xf32> to vector<2x32xf32>
    %418 = vector.extract_strided_slice %416 {offsets = [0, 0], sizes = [2, 32], strides = [1, 1]} : vector<2x128xf32> to vector<2x32xf32>
    %419 = arith.addf %417, %418 : vector<2x32xf32>
    %420 = arith.negf %419 : vector<2x32xf32>
    %421 = math.exp %420 : vector<2x32xf32>
    %cst_179 = arith.constant 1.000000e+00 : f32
    %422 = vector.broadcast %cst_179 : f32 to vector<2x32xf32>
    %423 = arith.addf %422, %421 : vector<2x32xf32>
    %424 = arith.divf %422, %423 : vector<2x32xf32>
    %425 = vector.extract_strided_slice %197 {offsets = [0, 32], sizes = [2, 32], strides = [1, 1]} : vector<2x128xf32> to vector<2x32xf32>
    %426 = vector.extract_strided_slice %416 {offsets = [0, 32], sizes = [2, 32], strides = [1, 1]} : vector<2x128xf32> to vector<2x32xf32>
    %427 = arith.addf %425, %426 : vector<2x32xf32>
    %428 = arith.negf %427 : vector<2x32xf32>
    %429 = math.exp %428 : vector<2x32xf32>
    %cst_180 = arith.constant 1.000000e+00 : f32
    %430 = vector.broadcast %cst_180 : f32 to vector<2x32xf32>
    %431 = arith.addf %430, %429 : vector<2x32xf32>
    %432 = arith.divf %430, %431 : vector<2x32xf32>
    %433 = vector.extract_strided_slice %197 {offsets = [0, 64], sizes = [2, 32], strides = [1, 1]} : vector<2x128xf32> to vector<2x32xf32>
    %434 = vector.extract_strided_slice %416 {offsets = [0, 64], sizes = [2, 32], strides = [1, 1]} : vector<2x128xf32> to vector<2x32xf32>
    %435 = arith.addf %434, %189 : vector<2x32xf32>
    %436 = arith.mulf %424, %435 : vector<2x32xf32>
    %437 = arith.addf %433, %436 : vector<2x32xf32>
    %438 = math.tanh %437 : vector<2x32xf32>
    %cst_181 = arith.constant 1.000000e+00 : f32
    %439 = vector.broadcast %cst_181 : f32 to vector<2x32xf32>
    %440 = arith.subf %439, %432 : vector<2x32xf32>
    %441 = arith.mulf %440, %438 : vector<2x32xf32>
    %442 = arith.mulf %432, %412 : vector<2x32xf32>
    %443 = arith.addf %441, %442 : vector<2x32xf32>
    %c0_182 = arith.constant 0 : index
    %c7_183 = arith.constant 7 : index
    %c0_184 = arith.constant 0 : index
    %444 = vector.load %arg9[%c0_182, %c7_183, %c0_184] : memref<2x8x32xf32, #tpu.memory_space<vmem>>, vector<2x1x32xf32>
    %445 = vector.shape_cast %444 : vector<2x1x32xf32> to vector<2x32xf32>
    %446 = vector.shape_cast %443 : vector<2x32xf32> to vector<2x1x32xf32>
    tpu.vector_store %arg9[%c0_182, %c7_183, %c0_184], %446 {strides = array<i32>} : memref<2x8x32xf32, #tpu.memory_space<vmem>>, vector<2x1x32xf32>,
    return
  }
}

</mosaic_0001>

<bundles_post_ra>
// kernel: tpu_custom_call.1
= control target key start
LH: loop header
LB: loop body
LE: loop exit
PB: predicated region body
PF: predicated region fallthrough
CT: control target
= control target key end

     0   :  { %s2820_s0 = inlined_call_operand.hbm [shape: f32[2,8,16], index: 0, kind: input, shape index: {}]   ;;  %s2821_s1 = inlined_call_operand.vmem [shape: s32[2,8], index: 1, kind: input, shape index: {}]   ;;  %s2822_s2 = inlined_call_operand.vmem [shape: f32[2,8], index: 2, kind: input, shape index: {}]   ;;  %s2823_s3 = inlined_call_operand.hbm [shape: f32[16,48], index: 3, kind: input, shape index: {}]   ;;  %s2824_s4 = inlined_call_operand.vmem [shape: f32[6,48], index: 4, kind: input, shape index: {}]   ;;  %s2825_s5 = inlined_call_operand.hbm [shape: f32[48,128], index: 5, kind: input, shape index: {}]   ;;  %s2826_s6 = inlined_call_operand.vmem [shape: f32[1,128], index: 6, kind: input, shape index: {}]   ;;  %s2827_s7 = inlined_call_operand.hbm [shape: f32[32,128], index: 7, kind: input, shape index: {}]   ;;  %s2828_s8 = inlined_call_operand.vmem [shape: f32[1,32], index: 8, kind: input, shape index: {}]   ;;  %s2829_s9 = inlined_call_operand.hbm [shape: f32[2,8,32], index: 9, kind: output, shape index: {}]  }
   0x1   :  { %2835 = sst [smem:[#allocation29_spill]] %s2826_s6 }
   0x2   :  { %2836 = sst [smem:[#allocation30_spill]] %s2829_s9 }
   0x3   :  { %14 = vsyncpa [#allocation4], 0 }
   0x4   :  { %15 = vsyncpa [#allocation6], 0 }
   0x5   :  { %16 = vsyncpa [#allocation9], 0 }
   0x6   :  { %17 = vsyncpa [#allocation11], 0 }
   0x7   :  { %18 = vsyncpa [#allocation14], 0 }
   0x8   :  { %19 = vsyncpa [#allocation5], 0  ;;  %s2201_s30 = smov [#allocation10]   ;;  %s2202_s11 = smov [#allocation3]  }
   0x9   :  { %s57_s10 = sshll.u32 %s2201_s30, 4  ;;  %s25_s12 = sshll.u32 %s2202_s11, 4  ;;  %s58_s10 = int_to_ptr.vmem [resolvable:$true] %s57_s10  ;;  %s2266_s12 = int_to_ptr.vmem [resolvable:$true] %s25_s12 }
   0xa   :  { %s2055_s15 = scalar_lea.hbm %s2823_s3, 256 }
   0xb   :  { %p2056_p0 = scmp.ne.s32.totalorder %s2823_s3, %s2055_s15  ;;  %p2059_p1 = scmp.lt.u32.totalorder %s2055_s15, %s2823_s3 }
   0xd   :  { %p2061_p2 = pnand %p2059_p1, %p2056_p0 }
   0xf   :  { %2064 = shalt.err (!%p2061_p2)
}
  0x10   :  { %s2065_s20 = scalar_lea.vmem %s58_s10, 256  ;;  %p2070_p4 = scmp.lt.s32.totalorder %s58_s10, %s58_s10 }
  0x11   :  { %p2066_p3 = scmp.ne.s32.totalorder %s58_s10, %s2065_s20  ;;  %p2071_p5 = scmp.lt.s32.totalorder %s2065_s20, %s2065_s20 }
  0x13   :  { %p2072_p6 = por %p2071_p5, %p2070_p4 }
  0x15   :  { %p2073_p7 = pnand %p2072_p6, %p2066_p3 }
  0x17   :  { %2076 = shalt.err (!%p2073_p7)
}
  0x18   :  { %s2830_s21 = smov 128   ;;  %s2831_s22 = smov 8  }
  0x19   :  { %63 = dma.hbm_to_vmem [thread:$0]  %s2823_s3, 256, %s58_s10, [#allocation11], %s2830_s21, %s2830_s21, %s2831_s22  }
  0x1a   :  { %s2077_s27 = scalar_lea.hbm %s2820_s0, 256 }
  0x1b   :  { %p2078_p8 = scmp.ne.s32.totalorder %s2820_s0, %s2077_s27  ;;  %p2081_p9 = scmp.lt.u32.totalorder %s2077_s27, %s2820_s0 }
  0x1d   :  { %p2083_p10 = pnand %p2081_p9, %p2078_p8 }
  0x1f   :  { %2086 = shalt.err (!%p2083_p10)
}
  0x20   :  { %s2087_s13 = scalar_lea.vmem %s2266_s12, 256  ;;  %p2092_p12 = scmp.lt.s32.totalorder %s2266_s12, %s2266_s12 }
  0x21   :  { %p2088_p11 = scmp.ne.s32.totalorder %s2266_s12, %s2087_s13  ;;  %p2093_p13 = scmp.lt.s32.totalorder %s2087_s13, %s2087_s13 }
  0x23   :  { %p2094_p0 = por %p2093_p13, %p2092_p12 }
  0x25   :  { %p2095_p1 = pnand %p2094_p0, %p2088_p11 }
  0x27   :  { %2098 = shalt.err (!%p2095_p1)
}
  0x28   :  { %31 = dma.hbm_to_vmem [thread:$0]  %s2820_s0, 256, %s2266_s12, [#allocation4], %s2830_s21, %s2830_s21, %s2831_s22  }
  0x29   :  { %s38_s16 = sshll.u32 %s2821_s1, 4  ;;  %s48_s19 = sshll.u32 %s2822_s2, 4  ;;  %s39_s16 = int_to_ptr.vmem [resolvable:$true] %s38_s16  ;;  %s49_s19 = int_to_ptr.vmem [resolvable:$true] %s48_s19 }
  0x2a   :  { %s2099_s20 = scalar_lea.vmem %s39_s16, 32  ;;  %p2104_p3 = scmp.lt.s32.totalorder %s39_s16, %s39_s16 }
  0x2b   :  { %p2100_p2 = scmp.ne.s32.totalorder %s39_s16, %s2099_s20  ;;  %p2105_p4 = scmp.lt.s32.totalorder %s2099_s20, %s2099_s20 }
  0x2d   :  { %p2106_p5 = por %p2105_p4, %p2104_p3 }
  0x2f   :  { %p2107_p6 = pnand %p2106_p5, %p2100_p2 }
  0x31   :  { %2110 = shalt.err (!%p2107_p6)
}
  0x32   :  { %s2205_s23 = smov [#allocation7]   ;;  %s2111_s0 = scalar_lea.vmem %s49_s19, 32 }
  0x33   :  { %41 = dma.vmem_to_smem %s39_s16, 32, %s2205_s23, [#allocation6]  }
  0x34   :  { %p2112_p7 = scmp.ne.s32.totalorder %s49_s19, %s2111_s0  ;;  %p2116_p8 = scmp.lt.s32.totalorder %s49_s19, %s49_s19 }
  0x35   :  { %p2117_p9 = scmp.lt.s32.totalorder %s2111_s0, %s2111_s0 }
  0x37   :  { %p2118_p10 = por %p2117_p9, %p2116_p8 }
  0x39   :  { %p2119_p11 = pnand %p2118_p10, %p2112_p7 }
  0x3b   :  { %2122 = shalt.err (!%p2119_p11)
}
  0x3c   :  { %s2206_s1 = smov [#allocation8]   ;;  %s2207_s2 = smov [#allocation12]  }
  0x3d   :  { %51 = dma.vmem_to_smem %s49_s19, 32, %s2206_s1, [#allocation9]  }
  0x3e   :  { %s71_s12 = sshll.u32 %s2207_s2, 4  ;;  %s2208_s24 = smov [#allocation13]   ;;  %s72_s12 = int_to_ptr.vmem [resolvable:$true] %s71_s12 }
  0x3f   :  { %s85_s25 = sshll.u32 %s2208_s24, 4  ;;  %s2123_s28 = scalar_lea.hbm %s2825_s5, 768  ;;  %s2309_s25 = int_to_ptr.vmem [resolvable:$true] %s85_s25 }
  0x40   :  { %p2124_p12 = scmp.ne.s32.totalorder %s2825_s5, %s2123_s28  ;;  %p2127_p13 = scmp.lt.u32.totalorder %s2123_s28, %s2825_s5 }
  0x42   :  { %p2129_p0 = pnand %p2127_p13, %p2124_p12 }
  0x44   :  { %2132 = shalt.err (!%p2129_p0)
}
  0x45   :  { %s2133_s3 = scalar_lea.vmem %s72_s12, 768  ;;  %p2138_p2 = scmp.lt.s32.totalorder %s72_s12, %s72_s12 }
  0x46   :  { %p2134_p1 = scmp.ne.s32.totalorder %s72_s12, %s2133_s3  ;;  %p2139_p3 = scmp.lt.s32.totalorder %s2133_s3, %s2133_s3 }
  0x48   :  { %p2140_p4 = por %p2139_p3, %p2138_p2 }
  0x4a   :  { %p2141_p5 = pnand %p2140_p4, %p2134_p1 }
  0x4c   :  { %2144 = shalt.err (!%p2141_p5)
}
  0x4d   :  { %77 = dma.hbm_to_vmem [thread:$0]  %s2825_s5, 768, %s72_s12, [#allocation11], %s2830_s21, %s2830_s21, %s2831_s22  }
  0x4e   :  { %s2145_s17 = scalar_lea.hbm %s2827_s7, 512 }
  0x4f   :  { %p2146_p6 = scmp.ne.s32.totalorder %s2827_s7, %s2145_s17  ;;  %p2149_p7 = scmp.lt.u32.totalorder %s2145_s17, %s2827_s7 }
  0x51   :  { %p2151_p8 = pnand %p2149_p7, %p2146_p6 }
  0x53   :  { %2154 = shalt.err (!%p2151_p8)
}
  0x54   :  { %s2155_s0 = scalar_lea.vmem %s2309_s25, 512  ;;  %p2160_p10 = scmp.lt.s32.totalorder %s2309_s25, %s2309_s25 }
  0x55   :  { %p2156_p9 = scmp.ne.s32.totalorder %s2309_s25, %s2155_s0  ;;  %p2161_p11 = scmp.lt.s32.totalorder %s2155_s0, %s2155_s0 }
  0x57   :  { %p2162_p12 = por %p2161_p11, %p2160_p10 }
  0x59   :  { %p2163_p13 = pnand %p2162_p12, %p2156_p9 }
  0x5b   :  { %2166 = shalt.err (!%p2163_p13)
}
  0x5c   :  { %91 = dma.hbm_to_vmem [thread:$0]  %s2827_s7, 512, %s2309_s25, [#allocation14], %s2830_s21, %s2830_s21, %s2831_s22  }
  0x5d   :  { %2189 = dma.done.wait [#allocation4], 256  }
  0x5e   :  { %2190 = vsyncadd [#allocation4], 4294967040 }
  0x5f   :  { %2191 = dma.done.wait [#allocation6], 32  }
  0x60   :  { %2192 = vsyncadd [#allocation6], 4294967264 }
  0x61   :  { %2193 = dma.done.wait [#allocation9], 32  }
  0x62   :  { %2194 = vsyncadd [#allocation9], 4294967264 }
  0x63   :  { %2195 = dma.done.wait [#allocation11], 1024  }
  0x64   :  { %2196 = vsyncadd [#allocation11], 4294966272 }
  0x65   :  { %2197 = dma.done.wait [#allocation14], 512  }
  0x66   :  { %2198 = vsyncadd [#allocation14], 4294966784 }
  0x67   :  { %112 = sfence }
  0x68   :  { %v115_v0 = vld [vmem:[#allocation10] sm:$0xff]  ;;  %v116_v1 = vld [vmem:[#allocation10 + $0x8] sm:$0xff]  ;;  %v113_v2 = vld [vmem:[#allocation3] sm:$0xff]  ;;  %vm117_vm0 = vcmask 130048   ;;  %v2209_v4 = vmov 0.0|0.0   ;;  %vm2210_vm1 = vmmov 0  }
  0x69   :  { %v1928_v3 = vpack.c.bf16 %v116_v1, %v115_v0  ;;  %1822 = vmatprep.mubr.msk.f32.mxu1 %vm117_vm0, %v113_v2  ;;  %1944 = vmatprep.subr.bf16.mxu0 %v2209_v4  ;;  %v490_v5 = vld [vmem:[#allocation13] sm:$0xff]  ;;  %v491_v6 = vld [vmem:[#allocation13 + $0x8] sm:$0xff]  ;;  %v492_v8 = vld [vmem:[#allocation13 + $0x10] sm:$0xff]  ;;  %v2211_v10 = vmov 0.0   ;;  %s2832_s12 = smov 64   ;;  %s2371_s24 = sld [smem:[#allocation7 + $0x81]] }
  0x6a   :  { %v2348_v7 = vpack.c.bf16 %v491_v6, %v490_v5  ;;  %v493_v9 = vld [vmem:[#allocation13 + $0x18] sm:$0xff]  ;;  %1848 = vmatprep.mubr.msk.f32.mxu0 %vm2210_vm1, %v2211_v10  ;;  %v395_v13 = vld [vmem:[#allocation12] sm:$0xff]  ;;  %v397_v16 = vld [vmem:[#allocation12 + $0x10] sm:$0xff]  ;;  %s2373_s25 = sld [smem:[#allocation7 + $0x82]]  ;;  %s2375_s26 = sld [smem:[#allocation7 + $0x83]]  ;;  %vm207_vm2 = vcmask 385024  }
  0x6b   :  { %1929 = vmatprep.subr.bf16.mxu1 %v1928_v3  ;;  %v114_v11 = vld [vmem:[#allocation3 + $0x8] sm:$0xff]  ;;  %v2353_v12 = vpack.c.bf16 %v493_v9, %v492_v8  ;;  %v398_v17 = vld [vmem:[#allocation12 + $0x18] sm:$0xff]  ;;  %v399_v19 = vld [vmem:[#allocation12 + $0x20] sm:$0xff]  ;;  %s2377_s27 = sld [smem:[#allocation7 + $0x84]]  ;;  %s2379_s28 = sld [smem:[#allocation8 + $0x80]]  ;;  %vm229_vm3 = vcmask 386049  }
  0x6c   :  { %1931 = vmatpush3.bf16.msra.mxu1 %v1928_v3  ;;  %1946 = vmatpush3.bf16.msra.mxu0 %v2348_v7  ;;  %v396_v14 = vld [vmem:[#allocation12 + $0x8] sm:$0xff]  ;;  %v1936_v18 = vpack.c.bf16 %v398_v17, %v397_v16  ;;  %v1750_v22 = vld [vmem:[%s2828_s8] ss:$0 sm:$0xff]  ;;  %s2381_s29 = sld [smem:[#allocation7 + $0x85]]  ;;  %s2383_s8 = sld [smem:[#allocation7 + $0x80]]  ;;  %vm254_vm4 = vcmask 387074  }
  0x6d   :  { %1947 = vmatprep.subr.bf16.mxu0 %v2209_v4  ;;  %v1932_v15 = vpack.c.bf16 %v396_v14, %v395_v13  ;;  %v400_v20 = vld [vmem:[#allocation12 + $0x28] sm:$0xff]  ;;  %581 = vrot.lane.b32.xlu0 %v1750_v22, %s2832_s12  ;;  %s2385_s30 = sld [smem:[#allocation8 + $0x81]]  ;;  %s2387_s11 = sld [smem:[#allocation8 + $0x82]]  ;;  %vm279_vm5 = vcmask 388099   ;;  %vm304_vm6 = vcmask 389124   ;;  %vm329_vm7 = vcmask 390149  }
  0x6e   :  { %v1940_v21 = vpack.c.bf16 %v400_v20, %v399_v19  ;;  %s2389_s13 = sld [smem:[#allocation8 + $0x83]]  ;;  %s2391_s3 = sld [smem:[#allocation8 + $0x84]]  ;;  %vm354_vm8 = vcmask 391174   ;;  %vm379_vm9 = vcmask 392199   ;;  %vm408_vm10 = vcmask 392192  }
  0x6f   :  { %1823 = vmatmul.mubr.msk.f32.vlgmr.msra.gmra.mrb[0].mxu1 %vm117_vm0, %v114_v11  ;;  %1933 = vmatprep.subr.bf16.mxu1 %v1932_v15  ;;  %s2393_s10 = sld [smem:[#allocation8 + $0x85]]  ;;  %s233_s16 = scalar_lea.vmem %s2824_s4, %s2371_s24  ;;  %vm500_vm11 = vcmask 261120   ;;  %vm641_vm12 = vcmask 253952  }
  0x70   :  { %1949 = vmatpush3.bf16.msra.mxu0 %v2353_v12  ;;  %1935 = vmatpush3.bf16.msra.mxu1 %v1932_v15  ;;  %s258_s19 = scalar_lea.vmem %s2824_s4, %s2373_s25  ;;  %s2403_s20 = sld [smem:[#allocation8 + $0x86]]  ;;  %v2457_v23 = vld [vmem:[%s233_s16] sm:$0x1] }
  0x71   :  { %1950 = vmatprep.subr.bf16.mxu0 %v2209_v4  ;;  %1937 = vmatprep.subr.bf16.mxu1 %v1936_v18  ;;  %s2405_s23 = sld [smem:[#allocation7 + $0x86]]  ;;  %s283_s1 = scalar_lea.vmem %s2824_s4, %s2375_s26  ;;  %v2459_v24 = vld [vmem:[%s258_s19] sm:$0x1]  ;;  %v213_v26 = vstv %s2379_s28  ;;  %v238_v30 = vrot.slane %v2457_v23, 7 }
  0x72   :  { %2837 = sst [smem:[#allocation22_spill]] %s2383_s8  ;;  %s2411_s7 = sld [smem:[#allocation7 + $0x87]]  ;;  %v2467_v25 = vld [vmem:[%s283_s1] sm:$0x1]  ;;  %v263_v32 = vrot.slane %v2459_v24, 6 }
  0x73   :  { %1849 = vmatmul.mubr.f32.vlgmr.msra.gmra.mrb[0].mxu0 %v2211_v10  ;;  %s308_s24 = scalar_lea.vmem %s2824_s4, %s2377_s27  ;;  %s2417_s14 = sld [smem:[#allocation8 + $0x87]]  ;;  %v235_v29 = vstv %s2385_s30  ;;  %v260_v31 = vstv %s2387_s11  ;;  %v288_v36 = vrot.slane %v2467_v25, 5 }
  0x74   :  { %1952 = vmatpush3.bf16.msra.mxu0 %v2348_v7  ;;  %1859 = vmatprep.mubr.msk.f32.mxu0 %vm2210_vm1, %v2211_v10  ;;  %s333_s17 = scalar_lea.vmem %s2824_s4, %s2381_s29  ;;  %s2423_s18 = sld [smem:[#allocation7 + $0x1]]  ;;  %v2476_v27 = vld [vmem:[%s308_s24] sm:$0x1]  ;;  %v285_v35 = vstv %s2389_s13  ;;  %v310_v37 = vstv %s2391_s3 }
  0x75   :  { %1953 = vmatprep.subr.bf16.mxu0 %v2209_v4  ;;  %1939 = vmatpush3.bf16.msra.mxu1 %v1936_v18  ;;  %s2425_s22 = sld [smem:[#allocation8]]  ;;  %s2427_s0 = sld [smem:[#allocation7 + $0x2]]  ;;  %v2478_v28 = vld [vmem:[%s333_s17] sm:$0x1]  ;;  %v335_v38 = vstv %s2393_s10  ;;  %v313_v39 = vrot.slane %v2476_v27, 4 }
  0x76   :  { %1941 = vmatprep.subr.bf16.mxu1 %v1940_v21  ;;  %2838 = sst [smem:[#allocation23_spill]] %s2403_s20  ;;  %s2429_s26 = sld [smem:[#allocation7]]  ;;  %v338_v40 = vrot.slane %v2478_v28, 3 }
  0x77   :  { %s2431_s5 = sld [smem:[#allocation7 + $0x3]]  ;;  %s2433_s21 = sld [smem:[#allocation7 + $0x4]] }
  0x78   :  { %1955 = vmatpush3.bf16.msra.mxu0 %v2353_v12  ;;  %s2435_s27 = sld [smem:[#allocation7 + $0x5]]  ;;  %s2437_s2 = sld [smem:[#allocation7 + $0x6]] }
  0x79   :  { %1962 = vmatprep.subr.bf16.mxu0 %v2209_v4  ;;  %1943 = vmatpush3.bf16.msra.mxu1 %v1940_v21  ;;  %2839 = sst [smem:[#allocation24_spill]] %s2417_s14  ;;  %s2439_s29 = sld [smem:[#allocation7 + $0x7]] }
  0x7a   :  { %1956 = vmatprep.subr.bf16.mxu1 %v2209_v4  ;;  %s358_s12 = scalar_lea.vmem %s2824_s4, %s2405_s23  ;;  %s2445_s9 = sld [smem:[#allocation8 + $0x1]] }
  0x7b   :  { %2840 = sst [smem:[#allocation25_spill]] %s2425_s22  ;;  %s383_s8 = scalar_lea.vmem %s2824_s4, %s2411_s7  ;;  %v2490_v33 = vld [vmem:[%s358_s12] sm:$0x1] }
  0x7c   :  { %2841 = sst [smem:[#allocation26_spill]] %s2429_s26  ;;  %s2451_s22 = sld [smem:[#allocation8 + $0x2]]  ;;  %v2492_v34 = vld [vmem:[%s383_s8] sm:$0x1]  ;;  %v363_v45 = vrot.slane %v2490_v33, 2 }
  0x7d   :  { %s2453_s14 = sld [smem:[#allocation8 + $0x3]]  ;;  %s2455_s20 = sld [smem:[#allocation8 + $0x4]]  ;;  %v388_v46 = vrot.slane %v2492_v34, 1 }
  0x7e   :  { %s220_s25 = scalar_lea.vmem %s2824_s4, %s2423_s18  ;;  %s245_s26 = scalar_lea.vmem %s2824_s4, %s2427_s0 }
  0x7f   :  { %s2484_s18 = sld [smem:[#allocation8 + $0x7]]  ;;  %s2844_s0 = sld [smem:[#allocation23_spill]]  ;;  %v2518_v43 = vld [vmem:[%s220_s25] sm:$0x1] }
  0x80   :  { %2842 = sst [smem:[#allocation27_spill]] %s2445_s9  ;;  %s2845_s23 = sld [smem:[#allocation24_spill]]  ;;  %v2520_v44 = vld [vmem:[%s245_s26] sm:$0x1]  ;;  %v225_v55 = vrot.slane %v2518_v43, 7 }
  0x81   :  { %s2465_s9 = sld [smem:[#allocation8 + $0x5]]  ;;  %s295_s17 = scalar_lea.vmem %s2824_s4, %s2433_s21  ;;  %v250_v56 = vrot.slane %v2520_v44, 6 }
  0x82   :  { %s320_s7 = scalar_lea.vmem %s2824_s4, %s2435_s27  ;;  %s2846_s30 = sld [smem:[#allocation25_spill]]  ;;  %v2533_v50 = vld [vmem:[%s295_s17] sm:$0x1]  ;;  %v247_v51 = vstv %s2451_s22 }
  0x83   :  { %2843 = sst [smem:[#allocation28_spill]] %s2455_s20  ;;  %s2847_s12 = sld [smem:[#allocation27_spill]]  ;;  %v2540_v52 = vld [vmem:[%s320_s7] sm:$0x1]  ;;  %v272_v57 = vstv %s2453_s14  ;;  %v300_v60 = vrot.slane %v2533_v50, 4 }
  0x84   :  { %s2473_s20 = sld [smem:[#allocation8 + $0x6]]  ;;  %s345_s8 = scalar_lea.vmem %s2824_s4, %s2437_s2  ;;  %v325_v1 = vrot.slane %v2540_v52, 3 }
  0x85   :  { %s370_s21 = scalar_lea.vmem %s2824_s4, %s2439_s29  ;;  %s2848_s27 = sld [smem:[#allocation22_spill]]  ;;  %v360_v41 = vstv %s2844_s0  ;;  %v2542_v53 = vld [vmem:[%s345_s8] sm:$0x1]  ;;  %v372_v3 = vstv %s2484_s18 }
  0x86   :  { %v385_v42 = vstv %s2845_s23  ;;  %s2849_s13 = sld [smem:[#allocation28_spill]]  ;;  %s2850_s2 = scalar_lea.vmem %s2824_s4, %s2431_s5  ;;  %v2544_v54 = vld [vmem:[%s370_s21] sm:$0x1]  ;;  %v350_v2 = vrot.slane %v2542_v53, 2 }
  0x87   :  { %v2531_v49 = vld [vmem:[%s2850_s2] sm:$0x1]  ;;  %v322_v61 = vstv %s2465_s9  ;;  %s2851_s22 = sld [smem:[#allocation26_spill]]  ;;  %v375_v5 = vrot.slane %v2544_v54, 1  ;;  %s2853_s18 = sld [smem:[#allocation29_spill]] }
  0x88   :  { %v203_v47 = vstv %s2846_s30  ;;  %v275_v59 = vrot.slane %v2531_v49, 5  ;;  %s2213_s0 = smov 96   ;;  %s2215_s23 = smov [#allocation15]  }
  0x89   :  { %v222_v48 = vstv %s2847_s12  ;;  %s1683_s28 = sshll.u32 %s2215_s23, 4  ;;  %s1684_s28 = int_to_ptr.vmem [resolvable:$true] %s1683_s28 }
  0x8a   :  { %v347_v62 = vstv %s2473_s20  ;;  %s2167_s24 = scalar_lea.vmem %s1684_s28, 256  ;;  %p2172_p1 = scmp.lt.s32.totalorder %s1684_s28, %s1684_s28 }
  0x8b   :  { %s211_s26 = scalar_lea.vmem %s2824_s4, %s2848_s27  ;;  %p2168_p0 = scmp.ne.s32.totalorder %s1684_s28, %s2167_s24 }
  0x8c   :  { %v297_v58 = vstv %s2849_s13  ;;  %v212_v0 = vld [vmem:[%s211_s26] sm:$0x1]  ;;  %p2173_p2 = scmp.lt.s32.totalorder %s2167_s24, %s2167_s24 }
  0x8d   :  { %s201_s14 = scalar_lea.vmem %s2824_s4, %s2851_s22  ;;  %s2852_s4 = smov 64  }
  0x8e   :  { %p2174_p3 = por %p2173_p2, %p2172_p1 }
  0x90   :  { %p2175_p4 = pnand %p2174_p3, %p2168_p0 }
  0xdf   :  { %v2572_v53 = vpop.permute.xlu0 %581 }
 0x142   :  { %v1824_v63 = vpop.f32.mrb[0].mxu1 }
 0x143   :  { %v214_v6 = vmul.f32 %v1824_v63, %v213_v26  ;;  %v236_v8 = vmul.f32 %v1824_v63, %v235_v29  ;;  %v261_v9 = vmul.f32 %v1824_v63, %v260_v31  ;;  %v286_v11 = vmul.f32 %v1824_v63, %v285_v35  ;;  %v190_v13 = vpop.f32.mrb[1].mxu1 }
 0x144   :  { %v311_v14 = vmul.f32 %v1824_v63, %v310_v37  ;;  %v336_v15 = vmul.f32 %v1824_v63, %v335_v38  ;;  %v361_v16 = vmul.f32 %v1824_v63, %v360_v41  ;;  %v386_v17 = vmul.f32 %v1824_v63, %v385_v42 }
 0x145   :  { %v215_v18 = vadd.f32 %v214_v6, %v212_v0  ;;  %v240_v19 = vadd.f32 %v238_v30, %v236_v8  ;;  %v265_v20 = vadd.f32 %v263_v32, %v261_v9  ;;  %v290_v21 = vadd.f32 %v288_v36, %v286_v11  ;;  %v202_v36 = vld [vmem:[%s201_s14] sm:$0x1] }
 0x146   :  { %v315_v22 = vadd.f32 %v313_v39, %v311_v14  ;;  %v340_v23 = vadd.f32 %v338_v40, %v336_v15  ;;  %v365_v24 = vadd.f32 %v363_v45, %v361_v16  ;;  %v390_v25 = vadd.f32 %v388_v46, %v386_v17  ;;  %v2562_v26 = vpop.f32.mrb[0].mxu0 }
 0x147   :  { %v216_v27 = vmax.f32 %v215_v18, 0.0  ;;  %v241_v28 = vmax.f32 %v240_v19, 0.0  ;;  %v266_v29 = vmax.f32 %v265_v20, 0.0  ;;  %v291_v31 = vmax.f32 %v290_v21, 0.0  ;;  %v1850_v33 = vpop.f32.mrb[1].mxu0 }
 0x148   :  { %v316_v34 = vmax.f32 %v315_v22, 0.0  ;;  %v341_v35 = vmax.f32 %v340_v23, 0.0  ;;  %v366_v30 = vmax.f32 %v365_v24, 0.0  ;;  %v391_v32 = vmax.f32 %v390_v25, 0.0 }
 0x149   :  { %217 = vst.msk [vmem:[#allocation2 + $0x1] sm:$0x1] %vm207_vm2, %v216_v27  ;;  %v204_v37 = vmul.f32 %v203_v47, %v190_v13  ;;  %v223_v38 = vmul.f32 %v222_v48, %v190_v13  ;;  %v248_v39 = vmul.f32 %v247_v51, %v190_v13  ;;  %v273_v40 = vmul.f32 %v272_v57, %v190_v13 }
 0x14a   :  { %242 = vst.msk [vmem:[#allocation2 + $0x2] sm:$0x2] %vm229_vm3, %v241_v28  ;;  %v298_v41 = vmul.f32 %v297_v58, %v190_v13  ;;  %v323_v42 = vmul.f32 %v322_v61, %v190_v13  ;;  %v348_v43 = vmul.f32 %v347_v62, %v190_v13  ;;  %v373_v44 = vmul.f32 %v372_v3, %v190_v13 }
 0x14b   :  { %267 = vst.msk [vmem:[#allocation2 + $0x3] sm:$0x4] %vm254_vm4, %v266_v29  ;;  %v205_v45 = vadd.f32 %v204_v37, %v202_v36  ;;  %v227_v46 = vadd.f32 %v225_v55, %v223_v38  ;;  %v252_v49 = vadd.f32 %v250_v56, %v248_v39  ;;  %v277_v50 = vadd.f32 %v275_v59, %v273_v40 }
 0x14c   :  { %292 = vst.msk [vmem:[#allocation2 + $0x4] sm:$0x8] %vm279_vm5, %v291_v31  ;;  %v302_v47 = vadd.f32 %v300_v60, %v298_v41  ;;  %v327_v48 = vadd.f32 %v325_v1, %v323_v42  ;;  %v352_v51 = vadd.f32 %v350_v2, %v348_v43  ;;  %v377_v52 = vadd.f32 %v375_v5, %v373_v44  ;;  %v1747_v60 = vld [vmem:[%s2853_s18] ss:$0 sm:$0xff] }
 0x14d   :  { %317 = vst.msk [vmem:[#allocation2 + $0x5] sm:$0x10] %vm304_vm6, %v316_v34  ;;  %v206_v54 = vmax.f32 %v205_v45, 0.0  ;;  %v228_v57 = vmax.f32 %v227_v46, 0.0  ;;  %v253_v63 = vmax.f32 %v252_v49, 0.0  ;;  %v278_v0 = vmax.f32 %v277_v50, 0.0 }
 0x14e   :  { %342 = vst.msk [vmem:[#allocation2 + $0x6] sm:$0x20] %vm329_vm7, %v341_v35  ;;  %v303_v6 = vmax.f32 %v302_v47, 0.0  ;;  %v328_v8 = vmax.f32 %v327_v48, 0.0  ;;  %v353_v58 = vmax.f32 %v352_v51, 0.0  ;;  %v378_v61 = vmax.f32 %v377_v52, 0.0 }
 0x14f   :  { %367 = vst.msk [vmem:[#allocation2 + $0x7] sm:$0x40] %vm354_vm8, %v366_v30  ;;  %v584_v55 = vadd.f32 %v2572_v53, %v2562_v26 }
 0x150   :  { %392 = vst.msk [vmem:[#allocation2 + $0x8] sm:$0x80] %vm379_vm9, %v391_v32  ;;  %380 = vst.msk [vmem:[#allocation2 + $0x7] sm:$0x80] %vm379_vm9, %v378_v61 }
 0x151   :  { %208 = vst.msk [vmem:[#allocation2] sm:$0x1] %vm207_vm2, %v206_v54  ;;  %586 = vrot.lane.b32.xlu0 %v584_v55, %s2852_s4 }
 0x152   :  { %230 = vst.msk [vmem:[#allocation2 + $0x1] sm:$0x2] %vm229_vm3, %v228_v57 }
 0x153   :  { %255 = vst.msk [vmem:[#allocation2 + $0x2] sm:$0x4] %vm254_vm4, %v253_v63 }
 0x154   :  { %280 = vst.msk [vmem:[#allocation2 + $0x3] sm:$0x8] %vm279_vm5, %v278_v0 }
 0x155   :  { %305 = vst.msk [vmem:[#allocation2 + $0x4] sm:$0x10] %vm304_vm6, %v303_v6 }
 0x156   :  { %330 = vst.msk [vmem:[#allocation2 + $0x5] sm:$0x20] %vm329_vm7, %v328_v8 }
 0x157   :  { %355 = vst.msk [vmem:[#allocation2 + $0x6] sm:$0x40] %vm354_vm8, %v353_v58 }
 0x15b   :  { %v393_v56 = vld [vmem:[#allocation2] sm:$0xff] }
 0x15c   :  { %1837 = vmatprep.mubr.msk.f32.mxu1 %vm408_vm10, %v393_v56 }
 0x15e   :  { %v394_v59 = vld [vmem:[#allocation2 + $0x8] sm:$0xff] }
 0x15f   :  { %1838 = vmatmul.mubr.msk.f32.vlgmr.msra.gmra.mrb[2].mxu1 %vm408_vm10, %v394_v59 }
 0x160   :  { %1958 = vmatpush3.bf16.msra.mxu1 %v2348_v7  ;;  %1870 = vmatprep.mubr.msk.f32.mxu1 %vm2210_vm1, %v2211_v10 }
 0x161   :  { %1959 = vmatprep.subr.bf16.mxu1 %v2209_v4 }
 0x164   :  { %1961 = vmatpush3.bf16.msra.mxu1 %v2353_v12 }
 0x165   :  { %1968 = vmatprep.subr.bf16.mxu1 %v2209_v4 }
 0x1c3   :  { %v587_v14 = vpop.permute.xlu0 %586 }
 0x232   :  { %v1839_v62 = vpop.f32.mrb[2].mxu1 }
 0x233   :  { %v2594_v1 = vadd.f32 %v1839_v62, %v1747_v60  ;;  %v481_v2 = vpop.f32.mrb[3].mxu1 }
 0x234   :  { %v2596_v3 = vadd.f32 %v1747_v60, %v481_v2 }
 0x236   :  { %v574_v5 = vadd.f32 %v2562_v26, %v2596_v3 }
 0x238   :  { %v1751_v9 = vmul.f32 -1.442695, %v574_v5 }
 0x23a   :  { %2007 = vpow2.f32 %v1751_v9 }
 0x244   :  { %v2008_v11 = vpop.eup %2007 }
 0x245   :  { %v578_v13 = vadd.f32 1.0, %v2008_v11 }
 0x247   :  { %2009 = vrcp.f32 %v578_v13 }
 0x251   :  { %v2010_v15 = vpop.eup %2009 }
 0x252   :  { %v589_v16 = vmul.f32 %v2010_v15, %v587_v14  ;;  %v596_v20 = vsub.f32 1.0, %v2010_v15  ;;  %v602_v22 = vmul.f32 0.0, %v2010_v15 }
 0x254   :  { %591 = vrot.lane.b32.xlu1 %v589_v16, %s2852_s4 }
 0x2c6   :  { %v592_v17 = vpop.permute.xlu1 %591 }
 0x2c7   :  { %v594_v18 = vadd.f32 %v592_v17, %v2596_v3 }
 0x2c9   :  { %2011 = vtanh.f32 %v594_v18 }
 0x2d3   :  { %v2012_v19 = vpop.eup %2011 }
 0x2d4   :  { %598 = vrot.lane.b32.xlu1 %v2012_v19, %s2213_s0 }
 0x346   :  { %v599_v21 = vpop.permute.xlu1 %598 }
 0x347   :  { %v601_v23 = vmul.f32 %v599_v21, %v596_v20 }
 0x349   :  { %v2603_v24 = vadd.f32 %v602_v22, %v601_v23 }
 0x34b   :  { %644 = vrot.lane.b32.xlu0 %v2603_v24, %s2213_s0  ;;  %v747_v42 = vrot.slane %v2603_v24, 6 }
 0x3bd   :  { %v645_v25 = vpop.permute.xlu0 %644 }
 0x3be   :  { %1860 = vmatmul.mubr.msk.f32.vlgmr.msra.gmra.mrb[2].mxu0 %vm500_vm11, %v645_v25 }
 0x3bf   :  { %1964 = vmatpush3.bf16.msra.mxu0 %v2348_v7  ;;  %1881 = vmatprep.mubr.msk.f32.mxu0 %vm2210_vm1, %v2211_v10 }
 0x3c0   :  { %1965 = vmatprep.subr.bf16.mxu0 %v2209_v4 }
 0x3c3   :  { %1967 = vmatpush3.bf16.msra.mxu0 %v2353_v12 }
 0x3c4   :  { %1974 = vmatprep.subr.bf16.mxu0 %v2209_v4 }
 0x491   :  { %v714_v26 = vpop.f32.mrb[2].mxu0 }
 0x492   :  { %v728_v27 = vadd.f32 %v714_v26, %v2572_v53  ;;  %v1861_v28 = vpop.f32.mrb[3].mxu0  ;;  %v719_v31 = vrot.slane %v714_v26, 6 }
 0x494   :  { %v730_v29 = vrot.slane %v728_v27, 6  ;;  %v721_v33 = vadd.f32 %v719_v31, %v2596_v3 }
 0x496   :  { %731 = vrot.lane.b32.xlu1 %v730_v29, %s2852_s4  ;;  %v1753_v34 = vmul.f32 -1.442695, %v721_v33 }
 0x498   :  { %2013 = vpow2.f32 %v1753_v34 }
 0x4a2   :  { %v2014_v35 = vpop.eup %2013 }
 0x4a3   :  { %v725_v30 = vadd.f32 1.0, %v2014_v35 }
 0x4a5   :  { %2015 = vrcp.f32 %v725_v30 }
 0x4af   :  { %v2016_v32 = vpop.eup %2015 }
 0x4b0   :  { %v741_v41 = vsub.f32 1.0, %v2016_v32  ;;  %v749_v45 = vmul.f32 %v2016_v32, %v747_v42 }
 0x508   :  { %v732_v36 = vpop.permute.xlu1 %731 }
 0x509   :  { %v734_v37 = vmul.f32 %v2016_v32, %v732_v36 }
 0x50b   :  { %736 = vrot.lane.b32.xlu0 %v734_v37, %s2852_s4 }
 0x57d   :  { %v737_v38 = vpop.permute.xlu0 %736 }
 0x57e   :  { %v739_v39 = vadd.f32 %v737_v38, %v2596_v3 }
 0x580   :  { %2017 = vtanh.f32 %v739_v39 }
 0x58a   :  { %v2018_v40 = vpop.eup %2017 }
 0x58b   :  { %743 = vrot.lane.b32.xlu1 %v2018_v40, %s2213_s0 }
 0x5fd   :  { %v744_v43 = vpop.permute.xlu1 %743 }
 0x5fe   :  { %v746_v44 = vmul.f32 %v744_v43, %v741_v41 }
 0x600   :  { %v2621_v46 = vadd.f32 %v749_v45, %v746_v44 }
 0x602   :  { %v792_v49 = vrot.slane %v2621_v46, 2  ;;  %v896_v62 = vrot.slane %v2621_v46, 6 }
 0x604   :  { %793 = vrot.lane.b32.xlu0 %v792_v49, %s2213_s0 }
 0x676   :  { %v794_v50 = vpop.permute.xlu0 %793 }
 0x677   :  { %1871 = vmatmul.mubr.msk.f32.vlgmr.msra.gmra.mrb[4].mxu1 %vm500_vm11, %v794_v50 }
 0x678   :  { %1970 = vmatpush3.bf16.msra.mxu1 %v2348_v7  ;;  %1892 = vmatprep.mubr.msk.f32.mxu1 %vm2210_vm1, %v2211_v10 }
 0x679   :  { %1971 = vmatprep.subr.bf16.mxu1 %v2209_v4 }
 0x67c   :  { %1973 = vmatpush3.bf16.msra.mxu1 %v2353_v12 }
 0x67d   :  { %1980 = vmatprep.subr.bf16.mxu1 %v2209_v4 }
 0x74a   :  { %v863_v47 = vpop.f32.mrb[4].mxu1 }
 0x74b   :  { %v877_v48 = vadd.f32 %v863_v47, %v2572_v53  ;;  %v1872_v51 = vpop.f32.mrb[5].mxu1  ;;  %v868_v54 = vrot.slane %v863_v47, 4 }
 0x74d   :  { %v879_v52 = vrot.slane %v877_v48, 4  ;;  %v870_v57 = vadd.f32 %v868_v54, %v2596_v3 }
 0x74f   :  { %880 = vrot.lane.b32.xlu1 %v879_v52, %s2852_s4  ;;  %v1755_v63 = vmul.f32 -1.442695, %v870_v57 }
 0x751   :  { %2019 = vpow2.f32 %v1755_v63 }
 0x75b   :  { %v2020_v0 = vpop.eup %2019 }
 0x75c   :  { %v874_v6 = vadd.f32 1.0, %v2020_v0 }
 0x75e   :  { %2021 = vrcp.f32 %v874_v6 }
 0x768   :  { %v2022_v8 = vpop.eup %2021 }
 0x769   :  { %v890_v60 = vsub.f32 1.0, %v2022_v8  ;;  %v898_v5 = vmul.f32 %v2022_v8, %v896_v62 }
 0x7c1   :  { %v881_v58 = vpop.permute.xlu1 %880 }
 0x7c2   :  { %v883_v61 = vmul.f32 %v2022_v8, %v881_v58 }
 0x7c4   :  { %885 = vrot.lane.b32.xlu0 %v883_v61, %s2852_s4 }
 0x836   :  { %v886_v55 = vpop.permute.xlu0 %885 }
 0x837   :  { %v888_v56 = vadd.f32 %v886_v55, %v2596_v3 }
 0x839   :  { %2023 = vtanh.f32 %v888_v56 }
 0x843   :  { %v2024_v59 = vpop.eup %2023 }
 0x844   :  { %892 = vrot.lane.b32.xlu1 %v2024_v59, %s2213_s0 }
 0x8b6   :  { %v893_v2 = vpop.permute.xlu1 %892 }
 0x8b7   :  { %v895_v9 = vmul.f32 %v893_v2, %v890_v60 }
 0x8b9   :  { %v2639_v11 = vadd.f32 %v898_v5, %v895_v9 }
 0x8bb   :  { %v940_v13 = vrot.slane %v2639_v11, 4  ;;  %v1044_v34 = vrot.slane %v2639_v11, 6 }
 0x8bd   :  { %941 = vrot.lane.b32.xlu0 %v940_v13, %s2213_s0 }
 0x92f   :  { %v942_v14 = vpop.permute.xlu0 %941 }
 0x930   :  { %1882 = vmatmul.mubr.msk.f32.vlgmr.msra.gmra.mrb[4].mxu0 %vm500_vm11, %v942_v14 }
 0x931   :  { %1976 = vmatpush3.bf16.msra.mxu0 %v2348_v7  ;;  %1903 = vmatprep.mubr.msk.f32.mxu0 %vm2210_vm1, %v2211_v10 }
 0x932   :  { %1977 = vmatprep.subr.bf16.mxu0 %v2209_v4 }
 0x935   :  { %1979 = vmatpush3.bf16.msra.mxu0 %v2353_v12 }
 0x936   :  { %1986 = vmatprep.subr.bf16.mxu0 %v2209_v4 }
 0xa03   :  { %v1011_v15 = vpop.f32.mrb[4].mxu0 }
 0xa04   :  { %v1025_v16 = vadd.f32 %v1011_v15, %v2572_v53  ;;  %v1883_v17 = vpop.f32.mrb[5].mxu0  ;;  %v1016_v19 = vrot.slane %v1011_v15, 2 }
 0xa06   :  { %v1027_v18 = vrot.slane %v1025_v16, 2  ;;  %v1018_v20 = vadd.f32 %v1016_v19, %v2596_v3 }
 0xa08   :  { %1028 = vrot.lane.b32.xlu1 %v1027_v18, %s2852_s4  ;;  %v1757_v21 = vmul.f32 -1.442695, %v1018_v20 }
 0xa0a   :  { %2025 = vpow2.f32 %v1757_v21 }
 0xa14   :  { %v2026_v22 = vpop.eup %2025 }
 0xa15   :  { %v1022_v23 = vadd.f32 1.0, %v2026_v22 }
 0xa17   :  { %2027 = vrcp.f32 %v1022_v23 }
 0xa21   :  { %v2028_v25 = vpop.eup %2027 }
 0xa22   :  { %v1038_v33 = vsub.f32 1.0, %v2028_v25  ;;  %v1046_v30 = vmul.f32 %v2028_v25, %v1044_v34 }
 0xa7a   :  { %v1029_v26 = vpop.permute.xlu1 %1028 }
 0xa7b   :  { %v1031_v27 = vmul.f32 %v2028_v25, %v1029_v26 }
 0xa7d   :  { %1033 = vrot.lane.b32.xlu0 %v1031_v27, %s2852_s4 }
 0xaef   :  { %v1034_v28 = vpop.permute.xlu0 %1033 }
 0xaf0   :  { %v1036_v29 = vadd.f32 %v1034_v28, %v2596_v3 }
 0xaf2   :  { %2029 = vtanh.f32 %v1036_v29 }
 0xafc   :  { %v2030_v31 = vpop.eup %2029 }
 0xafd   :  { %1040 = vrot.lane.b32.xlu1 %v2030_v31, %s2213_s0 }
 0xb6f   :  { %v1041_v35 = vpop.permute.xlu1 %1040 }
 0xb70   :  { %v1043_v32 = vmul.f32 %v1041_v35, %v1038_v33 }
 0xb72   :  { %v2657_v36 = vadd.f32 %v1046_v30, %v1043_v32 }
 0xb74   :  { %v1090_v37 = vrot.slane %v2657_v36, 6 }
 0xb76   :  { %1091 = vrot.lane.b32.xlu0 %v1090_v37, %s2213_s0 }
 0xbe8   :  { %v1092_v38 = vpop.permute.xlu0 %1091 }
 0xbe9   :  { %1893 = vmatmul.mubr.msk.f32.vlgmr.msra.gmra.mrb[6].mxu1 %vm500_vm11, %v1092_v38 }
 0xbea   :  { %1982 = vmatpush3.bf16.msra.mxu1 %v2348_v7  ;;  %1914 = vmatprep.mubr.msk.f32.mxu1 %vm2210_vm1, %v2211_v10 }
 0xbeb   :  { %1983 = vmatprep.subr.bf16.mxu1 %v2209_v4 }
 0xbee   :  { %1985 = vmatpush3.bf16.msra.mxu1 %v2353_v12 }
 0xcbc   :  { %v1161_v3 = vpop.f32.mrb[6].mxu1 }
 0xcbd   :  { %v1172_v39 = vadd.f32 %v1161_v3, %v2572_v53  ;;  %v1894_v40 = vpop.f32.mrb[7].mxu1  ;;  %v1165_v41 = vadd.f32 %v1161_v3, %v2594_v1 }
 0xcbf   :  { %1174 = vrot.lane.b32.xlu1 %v1172_v39, %s2852_s4  ;;  %v1759_v42 = vmul.f32 -1.442695, %v1165_v41 }
 0xcc1   :  { %2031 = vpow2.f32 %v1759_v42 }
 0xccb   :  { %v2032_v43 = vpop.eup %2031 }
 0xccc   :  { %v1169_v44 = vadd.f32 1.0, %v2032_v43 }
 0xcce   :  { %2033 = vrcp.f32 %v1169_v44 }
 0xcd8   :  { %v2034_v45 = vpop.eup %2033 }
 0xcd9   :  { %v1184_v52 = vsub.f32 1.0, %v2034_v45  ;;  %v1191_v57 = vmul.f32 %v2034_v45, %v1090_v37 }
 0xd31   :  { %v1175_v49 = vpop.permute.xlu1 %1174 }
 0xd32   :  { %v1177_v50 = vmul.f32 %v2034_v45, %v1175_v49 }
 0xd34   :  { %1179 = vrot.lane.b32.xlu0 %v1177_v50, %s2852_s4 }
 0xda6   :  { %v1180_v47 = vpop.permute.xlu0 %1179 }
 0xda7   :  { %v1182_v48 = vadd.f32 %v1180_v47, %v2594_v1 }
 0xda9   :  { %2035 = vtanh.f32 %v1182_v48 }
 0xdb3   :  { %v2036_v51 = vpop.eup %2035 }
 0xdb4   :  { %1186 = vrot.lane.b32.xlu1 %v2036_v51, %s2213_s0 }
 0xe26   :  { %v1187_v54 = vpop.permute.xlu1 %1186 }
 0xe27   :  { %v1189_v63 = vmul.f32 %v1187_v54, %v1184_v52 }
 0xe29   :  { %v2673_v0 = vadd.f32 %v1191_v57, %v1189_v63  ;;  %v2214_v57 = vmov 1966171168  }
 0xe2a   :  { %v606_v63 = vunpack.c.l.s4 %v2214_v57 }
 0xe2b   :  { %1232 = vrot.lane.b32.xlu0 %v2673_v0, %s2213_s0  ;;  %v1335_v14 = vrot.slane %v2673_v0, 6 }
 0xe9d   :  { %v1233_v6 = vpop.permute.xlu0 %1232 }
 0xe9e   :  { %1904 = vmatmul.mubr.msk.f32.vlgmr.msra.gmra.mrb[6].mxu0 %vm500_vm11, %v1233_v6  ;;  %v608_v6 = vlaneseq }
 0xe9f   :  { %1988 = vmatpush3.bf16.msra.mxu0 %v2348_v7  ;;  %1925 = vmatprep.mubr.msk.f32.mxu0 %vm2210_vm1, %v2211_v10 }
 0xea0   :  { %1989 = vmatprep.subr.bf16.mxu0 %v2209_v4 }
 0xea3   :  { %1991 = vmatpush3.bf16.msra.mxu0 %v2353_v12 }
 0xf71   :  { %v1302_v8 = vpop.f32.mrb[6].mxu0 }
 0xf72   :  { %v1316_v58 = vadd.f32 %v1302_v8, %v2572_v53  ;;  %v1905_v61 = vpop.f32.mrb[7].mxu0  ;;  %v1307_v56 = vrot.slane %v1302_v8, 6 }
 0xf73   :  { %v609_v61 = vshrl.u32 %v608_v6, 7 }
 0xf74   :  { %v1318_v55 = vrot.slane %v1316_v58, 6  ;;  %v1309_v59 = vadd.f32 %v1307_v56, %v2594_v1  ;;  %v607_v58 = vunpack.c.0.s8 %v606_v63 }
 0xf76   :  { %1319 = vrot.lane.b32.xlu1 %v1318_v55, %s2852_s4  ;;  %v1761_v60 = vmul.f32 -1.442695, %v1309_v59  ;;  %v2710_v55 = vsub.s32 %v607_v58, %v609_v61 }
 0xf78   :  { %2037 = vpow2.f32 %v1761_v60  ;;  %v758_v56 = vrot.slane %v2621_v46, %v2710_v55 }
 0xf82   :  { %v2038_v7 = vpop.eup %2037 }
 0xf83   :  { %v1313_v62 = vadd.f32 1.0, %v2038_v7 }
 0xf85   :  { %2039 = vrcp.f32 %v1313_v62  ;;  %v2719_v62 = vsub.s32 0, %v609_v61 }
 0xf8f   :  { %v2040_v10 = vpop.eup %2039 }
 0xf90   :  { %v1329_v13 = vsub.f32 1.0, %v2040_v10  ;;  %v1337_v17 = vmul.f32 %v2040_v10, %v1335_v14  ;;  %v1200_v14 = vrot.slane %v2673_v0, %v2710_v55 }
 0xfe8   :  { %v1320_v2 = vpop.permute.xlu1 %1319 }
 0xfe9   :  { %v1322_v4 = vmul.f32 %v2040_v10, %v1320_v2  ;;  %v901_v10 = vcombine.high %v2639_v11, %v2639_v11  ;;  %v1049_v2 = vcombine.high %v2657_v36, %v2657_v36 }
 0xfeb   :  { %1324 = vrot.lane.b32.xlu0 %v1322_v4, %s2852_s4  ;;  %v1056_v46 = vrot.slane %v1049_v2, %v2710_v55 }
 0xfed   :  { %v1064_v36 = vrot.slane %v1056_v46, %v2710_v55 }
0x105d   :  { %v1325_v12 = vpop.permute.xlu0 %1324 }
0x105e   :  { %v1327_v5 = vadd.f32 %v1325_v12, %v2594_v1 }
0x1060   :  { %2041 = vtanh.f32 %v1327_v5 }
0x106a   :  { %v2042_v9 = vpop.eup %2041 }
0x106b   :  { %1331 = vrot.lane.b32.xlu1 %v2042_v9, %s2213_s0  ;;  %v908_v9 = vrot.slane %v901_v10, %v2710_v55 }
0x10dd   :  { %v1332_v15 = vpop.permute.xlu1 %1331 }
0x10de   :  { %v1334_v16 = vmul.f32 %v1332_v15, %v1329_v13  ;;  %v916_v13 = vrot.slane %v908_v9, %v2710_v55 }
0x10e0   :  { %v2690_v18 = vadd.f32 %v1337_v17, %v1334_v16  ;;  %v927_v16 = vrot.slane %v916_v13, %v2719_v62  ;;  %v1072_v17 = vcombine.high %v1064_v36, %v1064_v36 }
0x10e2   :  { %v1380_v19 = vrot.slane %v2690_v18, 2  ;;  %v1484_v3 = vrot.slane %v2690_v18, 6  ;;  %v1346_v15 = vrot.slane %v2690_v18, %v2710_v55 }
0x10e4   :  { %1381 = vrot.lane.b32.xlu0 %v1380_v19, %s2213_s0 }
0x1156   :  { %v1382_v20 = vpop.permute.xlu0 %1381 }
0x1157   :  { %1915 = vmatmul.mubr.msk.f32.vlgmr.msra.gmra.mrb[8].mxu1 %vm500_vm11, %v1382_v20  ;;  %v1077_v20 = vrot.slane %v1072_v17, %v2719_v62 }
0x122a   :  { %v1451_v21 = vpop.f32.mrb[8].mxu1 }
0x122b   :  { %v1465_v22 = vadd.f32 %v1451_v21, %v2572_v53  ;;  %v1916_v23 = vpop.f32.mrb[9].mxu1  ;;  %v1456_v26 = vrot.slane %v1451_v21, 4  ;;  %v1208_v21 = vrot.slane %v1200_v14, %v2710_v55 }
0x122d   :  { %v1467_v25 = vrot.slane %v1465_v22, 4  ;;  %v1458_v27 = vadd.f32 %v1456_v26, %v2594_v1  ;;  %v1354_v22 = vrot.slane %v1346_v15, %v2710_v55  ;;  %v1219_v0 = vrot.slane %v1208_v21, %v2719_v62 }
0x122f   :  { %1468 = vrot.lane.b32.xlu1 %v1467_v25, %s2852_s4  ;;  %v1763_v28 = vmul.f32 -1.442695, %v1458_v27  ;;  %v1362_v23 = vcombine.high %v1354_v22, %v1354_v22 }
0x1231   :  { %2043 = vpow2.f32 %v1763_v28  ;;  %v1367_v25 = vrot.slane %v1362_v23, %v2719_v62 }
0x123b   :  { %v2044_v29 = vpop.eup %2043 }
0x123c   :  { %v1462_v31 = vadd.f32 1.0, %v2044_v29 }
0x123e   :  { %2045 = vrcp.f32 %v1462_v31 }
0x1248   :  { %v2046_v33 = vpop.eup %2045 }
0x1249   :  { %v1478_v38 = vsub.f32 1.0, %v2046_v33  ;;  %v1486_v40 = vmul.f32 %v2046_v33, %v1484_v3 }
0x12a1   :  { %v1469_v34 = vpop.permute.xlu1 %1468 }
0x12a2   :  { %v1471_v35 = vmul.f32 %v2046_v33, %v1469_v34 }
0x12a4   :  { %1473 = vrot.lane.b32.xlu0 %v1471_v35, %s2852_s4  ;;  %v759_v35 = vcombine.high %v758_v56, %v758_v56 }
0x1316   :  { %v1474_v30 = vpop.permute.xlu0 %1473 }
0x1317   :  { %v1476_v32 = vadd.f32 %v1474_v30, %v2594_v1 }
0x1319   :  { %2047 = vtanh.f32 %v1476_v32 }
0x1323   :  { %v2048_v37 = vpop.eup %2047 }
0x1324   :  { %1480 = vrot.lane.b32.xlu1 %v2048_v37, %s2213_s0  ;;  %v773_v37 = vrot.slane %v759_v35, %v2710_v55 }
0x1396   :  { %v1481_v39 = vpop.permute.xlu1 %1480 }
0x1397   :  { %v1483_v41 = vmul.f32 %v1481_v39, %v1478_v38  ;;  %v775_v39 = vcombine.high %v773_v37, %v773_v37 }
0x1399   :  { %v2702_v42 = vadd.f32 %v1486_v40, %v1483_v41  ;;  %v909_v40 = vcombine.high %v908_v9, %v908_v9  ;;  %v1057_v41 = vcombine.high %v1056_v46, %v1056_v46 }
0x139b   :  { %v1528_v43 = vrot.slane %v2702_v42, 4  ;;  %v1489_v19 = vcombine.high %v2702_v42, %v2702_v42  ;;  %v1632_v10 = vrot.slane %v2702_v42, 6 }
0x139d   :  { %1529 = vrot.lane.b32.xlu0 %v1528_v43, %s2213_s0  ;;  %v1496_v18 = vrot.slane %v1489_v19, %v2710_v55 }
0x139f   :  { %v1504_v26 = vrot.slane %v1496_v18, %v2710_v55  ;;  %v1497_v61 = vcombine.high %v1496_v18, %v1496_v18 }
0x13a1   :  { %v1515_v27 = vrot.slane %v1504_v26, %v2719_v62 }
0x140f   :  { %v1530_v44 = vpop.permute.xlu0 %1529 }
0x1410   :  { %1926 = vmatmul.mubr.msk.f32.vlgmr.msra.gmra.mrb[8].mxu0 %vm500_vm11, %v1530_v44  ;;  %v783_v44 = vrot.slane %v775_v39, %v2719_v62 }
0x14e3   :  { %v1599_v45 = vpop.f32.mrb[8].mxu0 }
0x14e4   :  { %v1613_v49 = vadd.f32 %v1599_v45, %v2572_v53  ;;  %v1927_v50 = vpop.f32.mrb[9].mxu0  ;;  %v1604_v48 = vrot.slane %v1599_v45, 2  ;;  %v611_v53 = vrot.slane %v2603_v24, %v2710_v55  ;;  %v766_v24 = vrot.slane %v758_v56, %v2710_v55 }
0x14e5   :  { %v923_v45 = vrot.slane %v909_v40, %v2710_v55  ;;  %v1511_v56 = vrot.slane %v1497_v61, %v2710_v55 }
0x14e6   :  { %v1615_v47 = vrot.slane %v1613_v49, 2  ;;  %v1606_v51 = vadd.f32 %v1604_v48, %v2594_v1  ;;  %v619_v7 = vrot.slane %v611_v53, %v2710_v55  ;;  %v774_v5 = vcombine.high %v766_v24, %v766_v24 }
0x14e7   :  { %v612_v34 = vcombine.high %v611_v53, %v611_v53  ;;  %v1071_v49 = vrot.slane %v1057_v41, %v2710_v55 }
0x14e8   :  { %1616 = vrot.lane.b32.xlu1 %v1615_v47, %s2852_s4  ;;  %v1765_v52 = vmul.f32 -1.442695, %v1606_v51  ;;  %v630_v12 = vrot.slane %v619_v7, %v2719_v62  ;;  %v779_v11 = vrot.slane %v774_v5, %v2719_v62  ;;  %v931_v47 = vrot.slane %v923_v45, %v2719_v62 }
0x14e9   :  { %v626_v32 = vrot.slane %v612_v34, %v2710_v55  ;;  %v1073_v48 = vcombine.high %v1071_v49, %v1071_v49  ;;  %v1201_v51 = vcombine.high %v1200_v14, %v1200_v14 }
0x14ea   :  { %2049 = vpow2.f32 %v1765_v52  ;;  %v1347_v52 = vcombine.high %v1346_v15, %v1346_v15 }
0x14eb   :  { %v634_v3 = vrot.slane %v626_v32, %v2719_v62  ;;  %v1081_v57 = vrot.slane %v1073_v48, %v2719_v62  ;;  %v1215_v63 = vrot.slane %v1201_v51, %v2710_v55 }
0x14ec   :  { %v1361_v6 = vrot.slane %v1347_v52, %v2710_v55 }
0x14ee   :  { %v1363_v58 = vcombine.high %v1361_v6, %v1361_v6 }
0x14f0   :  { %v1371_v53 = vrot.slane %v1363_v58, %v2719_v62 }
0x14f4   :  { %v2050_v54 = vpop.eup %2049 }
0x14f5   :  { %v1610_v8 = vadd.f32 1.0, %v2050_v54 }
0x14f7   :  { %2051 = vrcp.f32 %v1610_v8  ;;  %v1223_v8 = vrot.slane %v1215_v63, %v2719_v62 }
0x1501   :  { %v2716_v59 = vpop.eup %2051 }
0x1502   :  { %v1626_v7 = vsub.f32 1.0, %v2716_v59 }
0x155a   :  { %v1617_v60 = vpop.permute.xlu1 %1616 }
0x155b   :  { %v1619_v4 = vmul.f32 %v2716_v59, %v1617_v60  ;;  %v1519_v60 = vrot.slane %v1511_v56, %v2719_v62 }
0x155d   :  { %1621 = vrot.lane.b32.xlu0 %v1619_v4, %s2852_s4  ;;  %v1634_v4 = vmul.f32 %v2716_v59, %v1632_v10 }
0x1561   :  { %635 = vrot.lane.b32.xlu0 %v630_v12, %s2213_s0 }
0x1565   :  { %784 = vrot.lane.b32.xlu0 %v779_v11, %s2213_s0 }
0x1569   :  { %932 = vrot.lane.b32.xlu0 %v927_v16, %s2213_s0 }
0x156d   :  { %1082 = vrot.lane.b32.xlu0 %v1077_v20, %s2213_s0 }
0x1571   :  { %1224 = vrot.lane.b32.xlu0 %v1219_v0, %s2213_s0 }
0x1575   :  { %1372 = vrot.lane.b32.xlu0 %v1367_v25, %s2213_s0 }
0x1579   :  { %1520 = vrot.lane.b32.xlu0 %v1515_v27, %s2213_s0 }
0x15cf   :  { %v1622_v28 = vpop.permute.xlu0 %1621 }
0x15d0   :  { %v1624_v29 = vadd.f32 %v1622_v28, %v2594_v1 }
0x15d2   :  { %2053 = vtanh.f32 %v1624_v29 }
0x15d3   :  { %v636_v31 = vpop.permute.xlu0 %635 }
0x15d4   :  { %642 = vst.msk [vmem:[#allocation15] sm:$0x1] %vm641_vm12, %v636_v31 }
0x15d7   :  { %v785_v33 = vpop.permute.xlu0 %784 }
0x15d8   :  { %790 = vst.msk [vmem:[#allocation15 + $0x1] sm:$0x1] %vm641_vm12, %v785_v33 }
0x15db   :  { %v933_v30 = vpop.permute.xlu0 %932 }
0x15dc   :  { %v2054_v38 = vpop.eup %2053  ;;  %938 = vst.msk [vmem:[#allocation15 + $0x2] sm:$0x1] %vm641_vm12, %v933_v30 }
0x15dd   :  { %1628 = vrot.lane.b32.xlu1 %v2054_v38, %s2213_s0 }
0x15df   :  { %v1083_v1 = vpop.permute.xlu0 %1082 }
0x15e0   :  { %1088 = vst.msk [vmem:[#allocation15 + $0x3] sm:$0x1] %vm641_vm12, %v1083_v1 }
0x15e1   :  { %637 = vrot.lane.b32.xlu1 %v634_v3, %s2213_s0 }
0x15e3   :  { %v1225_v43 = vpop.permute.xlu0 %1224 }
0x15e4   :  { %1230 = vst.msk [vmem:[#allocation15 + $0x4] sm:$0x1] %vm641_vm12, %v1225_v43 }
0x15e5   :  { %786 = vrot.lane.b32.xlu1 %v783_v44, %s2213_s0 }
0x15e7   :  { %v1373_v50 = vpop.permute.xlu0 %1372 }
0x15e8   :  { %1378 = vst.msk [vmem:[#allocation15 + $0x5] sm:$0x1] %vm641_vm12, %v1373_v50 }
0x15e9   :  { %934 = vrot.lane.b32.xlu1 %v931_v47, %s2213_s0 }
0x15eb   :  { %v1521_v54 = vpop.permute.xlu0 %1520 }
0x15ec   :  { %1526 = vst.msk [vmem:[#allocation15 + $0x6] sm:$0x1] %vm641_vm12, %v1521_v54 }
0x15ed   :  { %1084 = vrot.lane.b32.xlu1 %v1081_v57, %s2213_s0 }
0x15f1   :  { %1226 = vrot.lane.b32.xlu1 %v1223_v8, %s2213_s0 }
0x15f5   :  { %1374 = vrot.lane.b32.xlu1 %v1371_v53, %s2213_s0 }
0x15f9   :  { %1522 = vrot.lane.b32.xlu1 %v1519_v60, %s2213_s0 }
0x164f   :  { %v1629_v2 = vpop.permute.xlu1 %1628 }
0x1650   :  { %v1631_v24 = vmul.f32 %v1629_v2, %v1626_v7 }
0x1652   :  { %v1635_v46 = vadd.f32 %v1634_v4, %v1631_v24 }
0x1653   :  { %v638_v12 = vpop.permute.xlu1 %637 }
0x1654   :  { %v1637_v5 = vcombine.high %v1635_v46, %v1635_v46  ;;  %643 = vst.msk [vmem:[#allocation15 + $0x8] sm:$0x1] %vm641_vm12, %v638_v12 }
0x1656   :  { %v1644_v9 = vrot.slane %v1637_v5, %v2710_v55 }
0x1657   :  { %v787_v11 = vpop.permute.xlu1 %786 }
0x1658   :  { %v1645_v13 = vcombine.high %v1644_v9, %v1644_v9  ;;  %791 = vst.msk [vmem:[#allocation15 + $0x9] sm:$0x1] %vm641_vm12, %v787_v11  ;;  %v1652_v36 = vrot.slane %v1644_v9, %v2710_v55 }
0x165a   :  { %v1660_v14 = vcombine.high %v1652_v36, %v1652_v36  ;;  %v1659_v42 = vrot.slane %v1645_v13, %v2710_v55 }
0x165b   :  { %v935_v15 = vpop.permute.xlu1 %934 }
0x165c   :  { %939 = vst.msk [vmem:[#allocation15 + $0xa] sm:$0x1] %vm641_vm12, %v935_v15  ;;  %v1665_v59 = vrot.slane %v1660_v14, %v2719_v62  ;;  %v1661_v16 = vcombine.high %v1659_v42, %v1659_v42 }
0x165e   :  { %1670 = vrot.lane.b32.xlu0 %v1665_v59, %s2213_s0  ;;  %v1669_v17 = vrot.slane %v1661_v16, %v2719_v62 }
0x165f   :  { %v1085_v19 = vpop.permute.xlu1 %1084 }
0x1660   :  { %1089 = vst.msk [vmem:[#allocation15 + $0xb] sm:$0x1] %vm641_vm12, %v1085_v19  ;;  %1672 = vrot.lane.b32.xlu1 %v1669_v17, %s2213_s0 }
0x1663   :  { %v1227_v20 = vpop.permute.xlu1 %1226 }
0x1664   :  { %1231 = vst.msk [vmem:[#allocation15 + $0xc] sm:$0x1] %vm641_vm12, %v1227_v20 }
0x1667   :  { %v1375_v21 = vpop.permute.xlu1 %1374 }
0x1668   :  { %1379 = vst.msk [vmem:[#allocation15 + $0xd] sm:$0x1] %vm641_vm12, %v1375_v21 }
0x166b   :  { %v1523_v55 = vpop.permute.xlu1 %1522 }
0x166c   :  { %1527 = vst.msk [vmem:[#allocation15 + $0xe] sm:$0x1] %vm641_vm12, %v1523_v55 }
0x16d0   :  { %v1671_v22 = vpop.permute.xlu0 %1670 }
0x16d1   :  { %1676 = vst.msk [vmem:[#allocation15 + $0x7] sm:$0x1] %vm641_vm12, %v1671_v22 }
0x16d2   :  { %v1673_v62 = vpop.permute.xlu1 %1672 }
0x16d3   :  { %1677 = vst.msk [vmem:[#allocation15 + $0xf] sm:$0x1] %vm641_vm12, %v1673_v62 }
0x16d4   :  { %2178 = shalt.err (!%p2175_p4)
}
0x16d5   :  { %s2854_s6 = sld [smem:[#allocation30_spill]] }
0x16db   :  { %s2179_s7 = scalar_lea.hbm %s2854_s6, 256 }
0x16dc   :  { %p2180_p5 = scmp.ne.s32.totalorder %s2854_s6, %s2179_s7  ;;  %p2183_p6 = scmp.lt.u32.totalorder %s2179_s7, %s2854_s6 }
0x16de   :  { %p2185_p7 = pnand %p2183_p6, %p2180_p5 }
0x16e0   :  { %2188 = shalt.err (!%p2185_p7)
}
0x16e1   :  { %s2855_s8 = smov 8   ;;  %s2856_s19 = smov 128  }
0x16e2   :  { %1689 = dma.vmem_to_hbm [thread:$0]  %s1684_s28, 256, %s2854_s6, [#allocation5], %s2856_s19, %s2856_s19, %s2855_s8  }
0x16e3   :  { %2199 = dma.done.wait [#allocation5], 256  }
0x16e4   :  { %2200 = vsyncadd [#allocation5], 4294967040 }
0x16e5   :  { %1693 = vsyncpa [#allocation4], 1 }
0x16e6   :  { %1694 = vsyncpa [#allocation11], 1 }
0x16e7   :  { %1695 = vsyncpa [#allocation14], 1 }
0x16e8   :  { %1696 = vsyncpa [#allocation5], 1 }
0x16e9   :  { %1697 = vsyncpa [#allocation6], 1 }
0x16ea   :  { %1698 = vsyncpa [#allocation9], 1 }

</bundles_post_ra>
